<compile_context>
chip_gen: v6e
topology: v6e:2x2x1
jax: 0.10.0
libtpu: 0.0.40
codegen_flags: <defaults>
</compile_context>

<pallas_src>
import functools

import jax
import jax.numpy as jnp
from jax import lax
from jax.experimental import pallas as pl
from jax.experimental.pallas import tpu as pltpu

EPS = 1e-5


def _round_up(x, m):
    return ((x + m - 1) // m) * m


def _pick_row_tile(h):
    """Largest divisor of H that is <= max(8, H//4) (keeps the grid >= 2 steps)."""
    cap = max(8, h // 4)
    best = 1
    for d in range(1, h + 1):
        if h % d == 0 and d <= cap:
            best = d
    return best


# ----------------------------- Pallas kernels ------------------------------ #

def _channel_sums_kernel(x_ref, o_ref, *, rows, tr, lanes):
    # x_ref: (tr, lanes) f32 block of the flattened activation. Lane-dense reads.
    i = pl.program_id(0)
    x = x_ref[...]
    # Mask the ragged tail block (cdiv grid): OOB rows must not pollute the sums.
    ridx = i * tr + lax.broadcasted_iota(jnp.int32, (tr, lanes), 0)
    x = jnp.where(ridx < rows, x, 0.0)
    o_ref[0, 0:1, :] = jnp.sum(x, axis=0, keepdims=True)
    o_ref[0, 1:2, :] = jnp.sum(x * x, axis=0, keepdims=True)


def _scale_shift_kernel(x_ref, s_ref, b_ref, o_ref):
    # Lane-dense BN apply: x (tr, lanes), s/b (1, lanes).
    o_ref[...] = x_ref[...] * s_ref[...] + b_ref[...]


def _fused_conv_kernel(x_ref, s1_ref, b1_ref, w_ref, y_ref, st_ref, *, TH, H, W, C):
    # x_ref : (1, H+2, W+2, C) f32  -- whole zero-padded image, resident per n
    # s1/b1 : (1, C) f32            -- BN1 scale/shift (precomputed)
    # w_ref : (9, C, C) bf16        -- conv weight, (kh*3+kw, Cin, Cout)
    # y_ref : (1, TH, W, C) f32     -- conv output tile
    # st_ref: (1, 1, 2, C) f32      -- per-tile BN2 partial [sum, sumsq]
    i = pl.program_id(1)
    r0 = i * TH                      # padded-row index of the halo window start
    Wp = W + 2

    x_blk = x_ref[0, pl.ds(pl.multiple_of(r0, TH), TH + 2), :, :]   # (TH+2, Wp, C)

    # BN1 (batch-stat affine) + ReLU prologue.
    scale = s1_ref[...].reshape(1, 1, C)
    shift = b1_ref[...].reshape(1, 1, C)
    a = jnp.maximum(x_blk * scale + shift, 0.0)

    # Zero the left/right conv padding columns (they hold relu(shift) after BN).
    pcol = lax.broadcasted_iota(jnp.int32, (Wp, C), 0)
    col_ok = ((pcol >= 1) & (pcol <= W))[None]                       # (1, Wp, C)
    a = jnp.where(col_ok, a, 0.0).astype(jnp.bfloat16)

    # Row-padding masks (only the top / bottom grid blocks touch padded rows).
    ridx = lax.broadcasted_iota(jnp.int32, (TH * W, C), 0)
    not_toppad = (ridx >= W) | (r0 != 0)            # applies to kh == 0 patches
    not_botpad = (ridx < TH * W - W) | (r0 != H - TH)  # applies to kh == 2 patches

    # 3x3 conv = 9 shifted (TH*W, C)bf16 @ (C, C)bf16 matmuls, f32 accumulation.
    acc = jnp.zeros((TH * W, C), jnp.float32)
    for kh in range(3):
        for kw in range(3):
            patch = a[kh:kh + TH, kw:kw + W, :].reshape(TH * W, C)
            if kh == 0:
                patch = jnp.where(not_toppad, patch, 0)
            elif kh == 2:
                patch = jnp.where(not_botpad, patch, 0)
            acc = acc + jnp.dot(patch, w_ref[kh * 3 + kw],
                                preferred_element_type=jnp.float32)

    y_ref[...] = acc.reshape(1, TH, W, C)
    # BN2 partial statistics (fused epilogue, no extra HBM pass over y).
    st_ref[0, 0, 0:1, :] = jnp.sum(acc, axis=0, keepdims=True)
    st_ref[0, 0, 1:2, :] = jnp.sum(acc * acc, axis=0, keepdims=True)


# ----------------------------- Pallas wrappers ------------------------------ #

def channel_sums(x, c):
    """Per-channel (sum, sum_of_squares) over an NHWC-contiguous f32 array."""
    total = x.size
    lanes = 128 if total % 128 == 0 else c          # lane-dense view when possible
    rows = total // lanes
    xf = x.reshape(rows, lanes)
    tr = min(512, _round_up(rows, 8))
    nb = pl.cdiv(rows, tr)
    kernel = functools.partial(_channel_sums_kernel, rows=rows, tr=tr, lanes=lanes)
    part = pl.pallas_call(
        kernel,
        grid=(nb,),
        in_specs=[pl.BlockSpec((tr, lanes), lambda i: (i, 0))],
        out_specs=pl.BlockSpec((1, 2, lanes), lambda i: (i, 0, 0)),
        out_shape=jax.ShapeDtypeStruct((nb, 2, lanes), jnp.float32),
        compiler_params=pltpu.CompilerParams(dimension_semantics=("parallel",)),
    )(xf)
    tot = jnp.sum(part, axis=0)                     # (2, lanes)
    tot = tot.reshape(2, lanes // c, c).sum(axis=1)  # fold lane groups per channel
    return tot[0], tot[1]


def scale_shift(y, scale, shift, c):
    """Lane-dense per-channel y*scale + shift over an NHWC-contiguous f32 array."""
    shape = y.shape
    total = y.size
    lanes = 128 if total % 128 == 0 else c
    rows = total // lanes
    yf = y.reshape(rows, lanes)
    s = jnp.tile(scale.reshape(1, c), (1, lanes // c)).astype(jnp.float32)
    b = jnp.tile(shift.reshape(1, c), (1, lanes // c)).astype(jnp.float32)
    tr = min(1024, _round_up(rows, 8))
    nb = pl.cdiv(rows, tr)
    out = pl.pallas_call(
        _scale_shift_kernel,
        grid=(nb,),
        in_specs=[pl.BlockSpec((tr, lanes), lambda i: (i, 0)),
                  pl.BlockSpec((1, lanes), lambda i: (0, 0)),
                  pl.BlockSpec((1, lanes), lambda i: (0, 0))],
        out_specs=pl.BlockSpec((tr, lanes), lambda i: (i, 0)),
        out_shape=jax.ShapeDtypeStruct((rows, lanes), jnp.float32),
        compiler_params=pltpu.CompilerParams(dimension_semantics=("parallel",)),
    )(yf, s, b)
    return out.reshape(shape)


def fused_conv(x_pad, scale1, shift1, w9, *, H, W, C, TH):
    """BN1-apply + ReLU + 3x3 'same' conv + BN2 partial stats, all in one kernel."""
    N = x_pad.shape[0]
    Hp, Wp = H + 2, W + 2
    HB = H // TH
    kernel = functools.partial(_fused_conv_kernel, TH=TH, H=H, W=W, C=C)
    y, st = pl.pallas_call(
        kernel,
        grid=(N, HB),
        in_specs=[
            pl.BlockSpec((1, Hp, Wp, C), lambda n, i: (n, 0, 0, 0)),  # resident image
            pl.BlockSpec((1, C), lambda n, i: (0, 0)),
            pl.BlockSpec((1, C), lambda n, i: (0, 0)),
            pl.BlockSpec((9, C, C), lambda n, i: (0, 0, 0)),
        ],
        out_specs=(
            pl.BlockSpec((1, TH, W, C), lambda n, i: (n, i, 0, 0)),
            pl.BlockSpec((1, 1, 2, C), lambda n, i: (n, i, 0, 0)),
        ),
        out_shape=(jax.ShapeDtypeStruct((N, H, W, C), jnp.float32),
                   jax.ShapeDtypeStruct((N, HB, 2, C), jnp.float32)),
        compiler_params=pltpu.CompilerParams(
            dimension_semantics=("parallel", "parallel")),
    )(x_pad, scale1, shift1, w9)
    return y, st


# ------------------------------- Module forward ----------------------------- #

def module_forward(x_nchw, params):
    n, c, h, w = x_nchw.shape
    cnt = float(n * h * w)

    # NCHW -> NHWC + zero pad (XLA fuses these into a single copy pass). The pad
    # zeros contribute nothing to BN1 sums, so stats are taken over x_pad directly.
    x_pad = jnp.pad(jnp.transpose(x_nchw, (0, 2, 3, 1)),
                    ((0, 0), (1, 1), (1, 1), (0, 0)))

    # BN1 batch statistics (biased variance).  Note: single-pass E[x^2]-E[x]^2.
    s1, sq1 = channel_sums(x_pad, c)
    mean1 = s1 / cnt
    var1 = jnp.maximum(sq1 / cnt - mean1 * mean1, 0.0)
    scale1 = params["gamma1"].reshape(-1) * lax.rsqrt(var1 + EPS)
    shift1 = params["beta1"].reshape(-1) - mean1 * scale1

    # Conv weight (Cout, Cin, 3, 3) -> (kh*3+kw, Cin, Cout), bf16 for the MXU.
    w9 = (jnp.transpose(params["conv_w"], (2, 3, 1, 0))
          .reshape(9, c, c).astype(jnp.bfloat16))

    th = _pick_row_tile(h)
    y, st = fused_conv(x_pad,
                       scale1.reshape(1, c).astype(jnp.float32),
                       shift1.reshape(1, c).astype(jnp.float32),
                       w9, H=h, W=w, C=c, TH=th)

    # BN2 batch statistics from the fused epilogue partials.
    st = jnp.sum(st, axis=(0, 1))                   # (2, C)
    mean2 = st[0] / cnt
    var2 = jnp.maximum(st[1] / cnt - mean2 * mean2, 0.0)
    scale2 = params["gamma2"].reshape(-1) * lax.rsqrt(var2 + EPS)
    shift2 = params["beta2"].reshape(-1) - mean2 * scale2

    out_nhwc = scale_shift(y, scale2, shift2, c).reshape(n, h, w, c)
    return jnp.transpose(out_nhwc, (0, 3, 1, 2))    # NHWC -> NCHW


if __name__ == "__main__":
    key = jax.random.PRNGKey(0)
    k_x, k_w, k_g1, k_b1, k_g2, k_b2 = jax.random.split(key, 6)

    C = 64                 # fixed by the module (BN(64), Conv 64->64)
    N, H, W = 2, 16, 16    # small demo shapes (real module uses 1x64x56x56)

    x = jax.random.normal(k_x, (N, C, H, W), dtype=jnp.float32)  # NCHW like PyTorch

    params = {
        "gamma1": 1.0 + 0.1 * jax.random.normal(k_g1, (C,), jnp.float32),
        "beta1": 0.1 * jax.random.normal(k_b1, (C,), jnp.float32),
        "conv_w": 0.05 * jax.random.normal(k_w, (C, C, 3, 3), jnp.float32),
        "gamma2": 1.0 + 0.1 * jax.random.normal(k_g2, (C,), jnp.float32),
        "beta2": 0.1 * jax.random.normal(k_b2, (C,), jnp.float32),
    }

    out = jax.jit(module_forward)(x, params)
    jax.block_until_ready(out)
    assert out.shape == (N, C, H, W) and out.dtype == jnp.float32
    print("KERNEL_OK")
</pallas_src>

<mosaic_0001>
module attributes {stable_mosaic.version = 11 : i64} {
  func.func @_channel_sums_kernel(%arg0: i32, %arg1: memref<328x128xf32, #tpu.memory_space<vmem>>, %arg2: memref<1x2x128xf32, #tpu.memory_space<vmem>>) attributes {dimension_semantics = [#tpu.dimension_semantics<parallel>], iteration_bounds = array<i64: 1>, scalar_prefetch = 0 : i64, scratch_operands = 0 : i64, tpu.core_type = #tpu.core_type<tc>, window_params = [{transform_indices = @transform_0, window_bounds = array<i64: 328, 128>}, {transform_indices = @transform_1, window_bounds = array<i64: 1, 2, 128>}]} {
    %c0 = arith.constant 0 : index
    %c0_0 = arith.constant 0 : index
    %0 = vector.load %arg1[%c0, %c0_0] : memref<328x128xf32, #tpu.memory_space<vmem>>, vector<328x128xf32>
    %c328_i32 = arith.constant 328 : i32
    %1 = arith.muli %arg0, %c328_i32 : i32
    %2 = tpu.iota {dimensions = array<i32: 0>} : vector<328x128xi32>
    %3 = vector.broadcast %1 : i32 to vector<328x128xi32>
    %4 = arith.addi %3, %2 : vector<328x128xi32>
    %c324_i32 = arith.constant 324 : i32
    %5 = vector.broadcast %c324_i32 : i32 to vector<328x128xi32>
    %6 = arith.cmpi slt, %4, %5 : vector<328x128xi32>
    %cst = arith.constant 0.000000e+00 : f32
    %7 = vector.broadcast %cst : f32 to vector<328x128xf32>
    %8 = arith.select %6, %0, %7 : vector<328x128xi1>, vector<328x128xf32>
    %cst_1 = arith.constant dense<0.000000e+00> : vector<128xf32>
    %9 = vector.multi_reduction <add>, %8, %cst_1 [0] : vector<328x128xf32> to vector<128xf32>
    %10 = vector.shape_cast %9 : vector<128xf32> to vector<1x128xf32>
    %c0_2 = arith.constant 0 : index
    %c0_3 = arith.constant 0 : index
    %c0_4 = arith.constant 0 : index
    %11 = vector.load %arg2[%c0_2, %c0_3, %c0_4] : memref<1x2x128xf32, #tpu.memory_space<vmem>>, vector<1x1x128xf32>
    %12 = vector.shape_cast %11 : vector<1x1x128xf32> to vector<1x128xf32>
    %13 = vector.shape_cast %10 : vector<1x128xf32> to vector<1x1x128xf32>
    tpu.vector_store %arg2[%c0_2, %c0_3, %c0_4], %13 {strides = array<i32>} : memref<1x2x128xf32, #tpu.memory_space<vmem>>, vector<1x1x128xf32>,
    %14 = arith.mulf %8, %8 : vector<328x128xf32>
    %cst_5 = arith.constant dense<0.000000e+00> : vector<128xf32>
    %15 = vector.multi_reduction <add>, %14, %cst_5 [0] : vector<328x128xf32> to vector<128xf32>
    %16 = vector.shape_cast %15 : vector<128xf32> to vector<1x128xf32>
    %c0_6 = arith.constant 0 : index
    %c1 = arith.constant 1 : index
    %c0_7 = arith.constant 0 : index
    %17 = vector.load %arg2[%c0_6, %c1, %c0_7] : memref<1x2x128xf32, #tpu.memory_space<vmem>>, vector<1x1x128xf32>
    %18 = vector.shape_cast %17 : vector<1x1x128xf32> to vector<1x128xf32>
    %19 = vector.shape_cast %16 : vector<1x128xf32> to vector<1x1x128xf32>
    tpu.vector_store %arg2[%c0_6, %c1, %c0_7], %19 {strides = array<i32>} : memref<1x2x128xf32, #tpu.memory_space<vmem>>, vector<1x1x128xf32>,
    return
  }
  func.func @transform_0(%arg0: i32) -> (i32, i32) {
    %c0_i32 = arith.constant 0 : i32
    %c0_i32_0 = arith.constant 0 : i32
    return %arg0, %c0_i32 : i32, i32
  }
  func.func @transform_1(%arg0: i32) -> (i32, i32, i32) {
    %c0_i32 = arith.constant 0 : i32
    %c0_i32_0 = arith.constant 0 : i32
    %c0_i32_1 = arith.constant 0 : i32
    return %arg0, %c0_i32, %c0_i32_0 : i32, i32, i32
  }
}

module attributes {stable_mosaic.version = 11 : i64} {
  func.func @_fused_conv_kernel(%arg0: i32, %arg1: i32, %arg2: memref<1x18x18x64xf32, #tpu.memory_space<vmem>>, %arg3: memref<1x64xf32, #tpu.memory_space<vmem>>, %arg4: memref<1x64xf32, #tpu.memory_space<vmem>>, %arg5: memref<9x64x64xbf16, #tpu.memory_space<vmem>>, %arg6: memref<1x8x16x64xf32, #tpu.memory_space<vmem>>, %arg7: memref<1x1x2x64xf32, #tpu.memory_space<vmem>>) attributes {dimension_semantics = [#tpu.dimension_semantics<parallel>, #tpu.dimension_semantics<parallel>], iteration_bounds = array<i64: 2, 2>, scalar_prefetch = 0 : i64, scratch_operands = 0 : i64, tpu.core_type = #tpu.core_type<tc>, window_params = [{transform_indices = @transform_0, window_bounds = array<i64: 1, 18, 18, 64>}, {pipeline_mode = #tpu.pipeline_mode<synchronous>, transform_indices = @transform_1, window_bounds = array<i64: 1, 64>}, {pipeline_mode = #tpu.pipeline_mode<synchronous>, transform_indices = @transform_2, window_bounds = array<i64: 1, 64>}, {pipeline_mode = #tpu.pipeline_mode<synchronous>, transform_indices = @transform_3, window_bounds = array<i64: 9, 64, 64>}, {transform_indices = @transform_4, window_bounds = array<i64: 1, 8, 16, 64>}, {transform_indices = @transform_5, window_bounds = array<i64: 1, 1, 2, 64>}]} {
    %c8_i32 = arith.constant 8 : i32
    %0 = arith.muli %arg1, %c8_i32 : i32
    %1 = tpu.assume_multiple %0, 8 : i32
    %c0 = arith.constant 0 : index
    %2 = arith.index_cast %1 : i32 to index
    %c0_0 = arith.constant 0 : index
    %c0_1 = arith.constant 0 : index
    %3 = vector.load %arg2[%c0, %2, %c0_0, %c0_1] : memref<1x18x18x64xf32, #tpu.memory_space<vmem>>, vector<1x10x18x64xf32>
    %4 = vector.shape_cast %3 : vector<1x10x18x64xf32> to vector<10x18x64xf32>
    %c0_2 = arith.constant 0 : index
    %c0_3 = arith.constant 0 : index
    %5 = vector.load %arg3[%c0_2, %c0_3] : memref<1x64xf32, #tpu.memory_space<vmem>>, vector<1x64xf32>
    %6 = vector.shape_cast %5 : vector<1x64xf32> to vector<1x1x64xf32>
    %c0_4 = arith.constant 0 : index
    %c0_5 = arith.constant 0 : index
    %7 = vector.load %arg4[%c0_4, %c0_5] : memref<1x64xf32, #tpu.memory_space<vmem>>, vector<1x64xf32>
    %8 = vector.shape_cast %7 : vector<1x64xf32> to vector<1x1x64xf32>
    %9 = vector.broadcast %6 : vector<1x1x64xf32> to vector<10x18x64xf32>
    %10 = arith.mulf %4, %9 : vector<10x18x64xf32>
    %11 = vector.broadcast %8 : vector<1x1x64xf32> to vector<10x18x64xf32>
    %12 = arith.addf %10, %11 : vector<10x18x64xf32>
    %cst = arith.constant 0.000000e+00 : f32
    %13 = vector.broadcast %cst : f32 to vector<10x18x64xf32>
    %14 = arith.maximumf %12, %13 : vector<10x18x64xf32>
    %15 = tpu.iota {dimensions = array<i32: 0>} : vector<18x64xi32>
    %c1_i32 = arith.constant 1 : i32
    %16 = vector.broadcast %c1_i32 : i32 to vector<18x64xi32>
    %17 = arith.cmpi sge, %15, %16 : vector<18x64xi32>
    %c16_i32 = arith.constant 16 : i32
    %18 = vector.broadcast %c16_i32 : i32 to vector<18x64xi32>
    %19 = arith.cmpi sle, %15, %18 : vector<18x64xi32>
    %20 = arith.andi %17, %19 : vector<18x64xi1>
    %21 = vector.shape_cast %20 : vector<18x64xi1> to vector<1x18x64xi1>
    %cst_6 = arith.constant 0.000000e+00 : f32
    %22 = vector.shape_cast %21 : vector<1x18x64xi1> to vector<1x18x64xi1>
    %23 = vector.broadcast %22 : vector<1x18x64xi1> to vector<10x18x64xi1>
    %24 = vector.broadcast %cst_6 : f32 to vector<10x18x64xf32>
    %25 = arith.select %23, %14, %24 : vector<10x18x64xi1>, vector<10x18x64xf32>
    %26 = arith.truncf %25 : vector<10x18x64xf32> to vector<10x18x64xbf16>
    %27 = tpu.iota {dimensions = array<i32: 0>} : vector<128x64xi32>
    %c16_i32_7 = arith.constant 16 : i32
    %28 = vector.broadcast %c16_i32_7 : i32 to vector<128x64xi32>
    %29 = arith.cmpi sge, %27, %28 : vector<128x64xi32>
    %c0_i32 = arith.constant 0 : i32
    %30 = arith.cmpi ne, %0, %c0_i32 : i32
    %31 = vector.broadcast %30 : i1 to vector<128x64xi1>
    %32 = arith.ori %29, %31 : vector<128x64xi1>
    %c112_i32 = arith.constant 112 : i32
    %33 = vector.broadcast %c112_i32 : i32 to vector<128x64xi32>
    %34 = arith.cmpi slt, %27, %33 : vector<128x64xi32>
    %c8_i32_8 = arith.constant 8 : i32
    %35 = arith.cmpi ne, %0, %c8_i32_8 : i32
    %36 = vector.broadcast %35 : i1 to vector<128x64xi1>
    %37 = arith.ori %34, %36 : vector<128x64xi1>
    %cst_9 = arith.constant 0.000000e+00 : f32
    %38 = vector.broadcast %cst_9 : f32 to vector<128x64xf32>
    %39 = vector.extract_strided_slice %26 {offsets = [0, 0, 0], sizes = [8, 16, 64], strides = [1, 1, 1]} : vector<10x18x64xbf16> to vector<8x16x64xbf16>
    %40 = vector.shape_cast %39 : vector<8x16x64xbf16> to vector<128x64xbf16>
    %c0_i32_10 = arith.constant 0 : i32
    %41 = arith.sitofp %c0_i32_10 : i32 to bf16
    %42 = vector.broadcast %41 : bf16 to vector<128x64xbf16>
    %43 = arith.select %32, %40, %42 : vector<128x64xi1>, vector<128x64xbf16>
    %c0_11 = arith.constant 0 : index
    %c0_12 = arith.constant 0 : index
    %c0_13 = arith.constant 0 : index
    %44 = vector.load %arg5[%c0_11, %c0_12, %c0_13] : memref<9x64x64xbf16, #tpu.memory_space<vmem>>, vector<1x64x64xbf16>
    %45 = vector.shape_cast %44 : vector<1x64x64xbf16> to vector<64x64xbf16>
    %cst_14 = arith.constant dense<0.000000e+00> : vector<128x64xf32>
    %46 = tpu.matmul %43, %45, %cst_14 {dimension_numbers = #tpu.dot_dimension_numbers<[1], [0], [0], [1], [0, 0, 1, 1], [], []>} : vector<128x64xbf16>, vector<64x64xbf16>, vector<128x64xf32> -> vector<128x64xf32>
    %47 = arith.addf %38, %46 : vector<128x64xf32>
    %48 = vector.extract_strided_slice %26 {offsets = [0, 1, 0], sizes = [8, 16, 64], strides = [1, 1, 1]} : vector<10x18x64xbf16> to vector<8x16x64xbf16>
    %49 = vector.shape_cast %48 : vector<8x16x64xbf16> to vector<128x64xbf16>
    %c0_i32_15 = arith.constant 0 : i32
    %50 = arith.sitofp %c0_i32_15 : i32 to bf16
    %51 = vector.broadcast %50 : bf16 to vector<128x64xbf16>
    %52 = arith.select %32, %49, %51 : vector<128x64xi1>, vector<128x64xbf16>
    %c1 = arith.constant 1 : index
    %c0_16 = arith.constant 0 : index
    %c0_17 = arith.constant 0 : index
    %53 = vector.load %arg5[%c1, %c0_16, %c0_17] : memref<9x64x64xbf16, #tpu.memory_space<vmem>>, vector<1x64x64xbf16>
    %54 = vector.shape_cast %53 : vector<1x64x64xbf16> to vector<64x64xbf16>
    %cst_18 = arith.constant dense<0.000000e+00> : vector<128x64xf32>
    %55 = tpu.matmul %52, %54, %cst_18 {dimension_numbers = #tpu.dot_dimension_numbers<[1], [0], [0], [1], [0, 0, 1, 1], [], []>} : vector<128x64xbf16>, vector<64x64xbf16>, vector<128x64xf32> -> vector<128x64xf32>
    %56 = arith.addf %47, %55 : vector<128x64xf32>
    %57 = vector.extract_strided_slice %26 {offsets = [0, 2, 0], sizes = [8, 16, 64], strides = [1, 1, 1]} : vector<10x18x64xbf16> to vector<8x16x64xbf16>
    %58 = vector.shape_cast %57 : vector<8x16x64xbf16> to vector<128x64xbf16>
    %c0_i32_19 = arith.constant 0 : i32
    %59 = arith.sitofp %c0_i32_19 : i32 to bf16
    %60 = vector.broadcast %59 : bf16 to vector<128x64xbf16>
    %61 = arith.select %32, %58, %60 : vector<128x64xi1>, vector<128x64xbf16>
    %c2 = arith.constant 2 : index
    %c0_20 = arith.constant 0 : index
    %c0_21 = arith.constant 0 : index
    %62 = vector.load %arg5[%c2, %c0_20, %c0_21] : memref<9x64x64xbf16, #tpu.memory_space<vmem>>, vector<1x64x64xbf16>
    %63 = vector.shape_cast %62 : vector<1x64x64xbf16> to vector<64x64xbf16>
    %cst_22 = arith.constant dense<0.000000e+00> : vector<128x64xf32>
    %64 = tpu.matmul %61, %63, %cst_22 {dimension_numbers = #tpu.dot_dimension_numbers<[1], [0], [0], [1], [0, 0, 1, 1], [], []>} : vector<128x64xbf16>, vector<64x64xbf16>, vector<128x64xf32> -> vector<128x64xf32>
    %65 = arith.addf %56, %64 : vector<128x64xf32>
    %66 = vector.extract_strided_slice %26 {offsets = [1, 0, 0], sizes = [8, 16, 64], strides = [1, 1, 1]} : vector<10x18x64xbf16> to vector<8x16x64xbf16>
    %67 = vector.shape_cast %66 : vector<8x16x64xbf16> to vector<128x64xbf16>
    %c3 = arith.constant 3 : index
    %c0_23 = arith.constant 0 : index
    %c0_24 = arith.constant 0 : index
    %68 = vector.load %arg5[%c3, %c0_23, %c0_24] : memref<9x64x64xbf16, #tpu.memory_space<vmem>>, vector<1x64x64xbf16>
    %69 = vector.shape_cast %68 : vector<1x64x64xbf16> to vector<64x64xbf16>
    %cst_25 = arith.constant dense<0.000000e+00> : vector<128x64xf32>
    %70 = tpu.matmul %67, %69, %cst_25 {dimension_numbers = #tpu.dot_dimension_numbers<[1], [0], [0], [1], [0, 0, 1, 1], [], []>} : vector<128x64xbf16>, vector<64x64xbf16>, vector<128x64xf32> -> vector<128x64xf32>
    %71 = arith.addf %65, %70 : vector<128x64xf32>
    %72 = vector.extract_strided_slice %26 {offsets = [1, 1, 0], sizes = [8, 16, 64], strides = [1, 1, 1]} : vector<10x18x64xbf16> to vector<8x16x64xbf16>
    %73 = vector.shape_cast %72 : vector<8x16x64xbf16> to vector<128x64xbf16>
    %c4 = arith.constant 4 : index
    %c0_26 = arith.constant 0 : index
    %c0_27 = arith.constant 0 : index
    %74 = vector.load %arg5[%c4, %c0_26, %c0_27] : memref<9x64x64xbf16, #tpu.memory_space<vmem>>, vector<1x64x64xbf16>
    %75 = vector.shape_cast %74 : vector<1x64x64xbf16> to vector<64x64xbf16>
    %cst_28 = arith.constant dense<0.000000e+00> : vector<128x64xf32>
    %76 = tpu.matmul %73, %75, %cst_28 {dimension_numbers = #tpu.dot_dimension_numbers<[1], [0], [0], [1], [0, 0, 1, 1], [], []>} : vector<128x64xbf16>, vector<64x64xbf16>, vector<128x64xf32> -> vector<128x64xf32>
    %77 = arith.addf %71, %76 : vector<128x64xf32>
    %78 = vector.extract_strided_slice %26 {offsets = [1, 2, 0], sizes = [8, 16, 64], strides = [1, 1, 1]} : vector<10x18x64xbf16> to vector<8x16x64xbf16>
    %79 = vector.shape_cast %78 : vector<8x16x64xbf16> to vector<128x64xbf16>
    %c5 = arith.constant 5 : index
    %c0_29 = arith.constant 0 : index
    %c0_30 = arith.constant 0 : index
    %80 = vector.load %arg5[%c5, %c0_29, %c0_30] : memref<9x64x64xbf16, #tpu.memory_space<vmem>>, vector<1x64x64xbf16>
    %81 = vector.shape_cast %80 : vector<1x64x64xbf16> to vector<64x64xbf16>
    %cst_31 = arith.constant dense<0.000000e+00> : vector<128x64xf32>
    %82 = tpu.matmul %79, %81, %cst_31 {dimension_numbers = #tpu.dot_dimension_numbers<[1], [0], [0], [1], [0, 0, 1, 1], [], []>} : vector<128x64xbf16>, vector<64x64xbf16>, vector<128x64xf32> -> vector<128x64xf32>
    %83 = arith.addf %77, %82 : vector<128x64xf32>
    %84 = vector.extract_strided_slice %26 {offsets = [2, 0, 0], sizes = [8, 16, 64], strides = [1, 1, 1]} : vector<10x18x64xbf16> to vector<8x16x64xbf16>
    %85 = vector.shape_cast %84 : vector<8x16x64xbf16> to vector<128x64xbf16>
    %c0_i32_32 = arith.constant 0 : i32
    %86 = arith.sitofp %c0_i32_32 : i32 to bf16
    %87 = vector.broadcast %86 : bf16 to vector<128x64xbf16>
    %88 = arith.select %37, %85, %87 : vector<128x64xi1>, vector<128x64xbf16>
    %c6 = arith.constant 6 : index
    %c0_33 = arith.constant 0 : index
    %c0_34 = arith.constant 0 : index
    %89 = vector.load %arg5[%c6, %c0_33, %c0_34] : memref<9x64x64xbf16, #tpu.memory_space<vmem>>, vector<1x64x64xbf16>
    %90 = vector.shape_cast %89 : vector<1x64x64xbf16> to vector<64x64xbf16>
    %cst_35 = arith.constant dense<0.000000e+00> : vector<128x64xf32>
    %91 = tpu.matmul %88, %90, %cst_35 {dimension_numbers = #tpu.dot_dimension_numbers<[1], [0], [0], [1], [0, 0, 1, 1], [], []>} : vector<128x64xbf16>, vector<64x64xbf16>, vector<128x64xf32> -> vector<128x64xf32>
    %92 = arith.addf %83, %91 : vector<128x64xf32>
    %93 = vector.extract_strided_slice %26 {offsets = [2, 1, 0], sizes = [8, 16, 64], strides = [1, 1, 1]} : vector<10x18x64xbf16> to vector<8x16x64xbf16>
    %94 = vector.shape_cast %93 : vector<8x16x64xbf16> to vector<128x64xbf16>
    %c0_i32_36 = arith.constant 0 : i32
    %95 = arith.sitofp %c0_i32_36 : i32 to bf16
    %96 = vector.broadcast %95 : bf16 to vector<128x64xbf16>
    %97 = arith.select %37, %94, %96 : vector<128x64xi1>, vector<128x64xbf16>
    %c7 = arith.constant 7 : index
    %c0_37 = arith.constant 0 : index
    %c0_38 = arith.constant 0 : index
    %98 = vector.load %arg5[%c7, %c0_37, %c0_38] : memref<9x64x64xbf16, #tpu.memory_space<vmem>>, vector<1x64x64xbf16>
    %99 = vector.shape_cast %98 : vector<1x64x64xbf16> to vector<64x64xbf16>
    %cst_39 = arith.constant dense<0.000000e+00> : vector<128x64xf32>
    %100 = tpu.matmul %97, %99, %cst_39 {dimension_numbers = #tpu.dot_dimension_numbers<[1], [0], [0], [1], [0, 0, 1, 1], [], []>} : vector<128x64xbf16>, vector<64x64xbf16>, vector<128x64xf32> -> vector<128x64xf32>
    %101 = arith.addf %92, %100 : vector<128x64xf32>
    %102 = vector.extract_strided_slice %26 {offsets = [2, 2, 0], sizes = [8, 16, 64], strides = [1, 1, 1]} : vector<10x18x64xbf16> to vector<8x16x64xbf16>
    %103 = vector.shape_cast %102 : vector<8x16x64xbf16> to vector<128x64xbf16>
    %c0_i32_40 = arith.constant 0 : i32
    %104 = arith.sitofp %c0_i32_40 : i32 to bf16
    %105 = vector.broadcast %104 : bf16 to vector<128x64xbf16>
    %106 = arith.select %37, %103, %105 : vector<128x64xi1>, vector<128x64xbf16>
    %c8 = arith.constant 8 : index
    %c0_41 = arith.constant 0 : index
    %c0_42 = arith.constant 0 : index
    %107 = vector.load %arg5[%c8, %c0_41, %c0_42] : memref<9x64x64xbf16, #tpu.memory_space<vmem>>, vector<1x64x64xbf16>
    %108 = vector.shape_cast %107 : vector<1x64x64xbf16> to vector<64x64xbf16>
    %cst_43 = arith.constant dense<0.000000e+00> : vector<128x64xf32>
    %109 = tpu.matmul %106, %108, %cst_43 {dimension_numbers = #tpu.dot_dimension_numbers<[1], [0], [0], [1], [0, 0, 1, 1], [], []>} : vector<128x64xbf16>, vector<64x64xbf16>, vector<128x64xf32> -> vector<128x64xf32>
    %110 = arith.addf %101, %109 : vector<128x64xf32>
    %111 = vector.shape_cast %110 : vector<128x64xf32> to vector<1x8x16x64xf32>
    %c0_44 = arith.constant 0 : index
    %c0_45 = arith.constant 0 : index
    %c0_46 = arith.constant 0 : index
    %c0_47 = arith.constant 0 : index
    %112 = vector.load %arg6[%c0_44, %c0_45, %c0_46, %c0_47] : memref<1x8x16x64xf32, #tpu.memory_space<vmem>>, vector<1x8x16x64xf32>
    tpu.vector_store %arg6[%c0_44, %c0_45, %c0_46, %c0_47], %111 {strides = array<i32>} : memref<1x8x16x64xf32, #tpu.memory_space<vmem>>, vector<1x8x16x64xf32>,
    %cst_48 = arith.constant dense<0.000000e+00> : vector<64xf32>
    %113 = vector.multi_reduction <add>, %110, %cst_48 [0] : vector<128x64xf32> to vector<64xf32>
    %114 = vector.shape_cast %113 : vector<64xf32> to vector<1x64xf32>
    %c0_49 = arith.constant 0 : index
    %c0_50 = arith.constant 0 : index
    %c0_51 = arith.constant 0 : index
    %c0_52 = arith.constant 0 : index
    %115 = vector.load %arg7[%c0_49, %c0_50, %c0_51, %c0_52] : memref<1x1x2x64xf32, #tpu.memory_space<vmem>>, vector<1x1x1x64xf32>
    %116 = vector.shape_cast %115 : vector<1x1x1x64xf32> to vector<1x64xf32>
    %117 = vector.shape_cast %114 : vector<1x64xf32> to vector<1x1x1x64xf32>
    tpu.vector_store %arg7[%c0_49, %c0_50, %c0_51, %c0_52], %117 {strides = array<i32>} : memref<1x1x2x64xf32, #tpu.memory_space<vmem>>, vector<1x1x1x64xf32>,
    %118 = arith.mulf %110, %110 : vector<128x64xf32>
    %cst_53 = arith.constant dense<0.000000e+00> : vector<64xf32>
    %119 = vector.multi_reduction <add>, %118, %cst_53 [0] : vector<128x64xf32> to vector<64xf32>
    %120 = vector.shape_cast %119 : vector<64xf32> to vector<1x64xf32>
    %c0_54 = arith.constant 0 : index
    %c0_55 = arith.constant 0 : index
    %c1_56 = arith.constant 1 : index
    %c0_57 = arith.constant 0 : index
    %121 = vector.load %arg7[%c0_54, %c0_55, %c1_56, %c0_57] : memref<1x1x2x64xf32, #tpu.memory_space<vmem>>, vector<1x1x1x64xf32>
    %122 = vector.shape_cast %121 : vector<1x1x1x64xf32> to vector<1x64xf32>
    %123 = vector.shape_cast %120 : vector<1x64xf32> to vector<1x1x1x64xf32>
    tpu.vector_store %arg7[%c0_54, %c0_55, %c1_56, %c0_57], %123 {strides = array<i32>} : memref<1x1x2x64xf32, #tpu.memory_space<vmem>>, vector<1x1x1x64xf32>,
    return
  }
  func.func @transform_0(%arg0: i32, %arg1: i32) -> (i32, i32, i32, i32) {
    %c0_i32 = arith.constant 0 : i32
    %c0_i32_0 = arith.constant 0 : i32
    %c0_i32_1 = arith.constant 0 : i32
    %c0_i32_2 = arith.constant 0 : i32
    return %arg0, %c0_i32, %c0_i32_0, %c0_i32_1 : i32, i32, i32, i32
  }
  func.func @transform_1(%arg0: i32, %arg1: i32) -> (i32, i32) {
    %c0_i32 = arith.constant 0 : i32
    %c0_i32_0 = arith.constant 0 : i32
    %c0_i32_1 = arith.constant 0 : i32
    return %c0_i32, %c0_i32_0 : i32, i32
  }
  func.func @transform_2(%arg0: i32, %arg1: i32) -> (i32, i32) {
    %c0_i32 = arith.constant 0 : i32
    %c0_i32_0 = arith.constant 0 : i32
    %c0_i32_1 = arith.constant 0 : i32
    return %c0_i32, %c0_i32_0 : i32, i32
  }
  func.func @transform_3(%arg0: i32, %arg1: i32) -> (i32, i32, i32) {
    %c0_i32 = arith.constant 0 : i32
    %c0_i32_0 = arith.constant 0 : i32
    %c0_i32_1 = arith.constant 0 : i32
    %c0_i32_2 = arith.constant 0 : i32
    return %c0_i32, %c0_i32_0, %c0_i32_1 : i32, i32, i32
  }
  func.func @transform_4(%arg0: i32, %arg1: i32) -> (i32, i32, i32, i32) {
    %c0_i32 = arith.constant 0 : i32
    %c0_i32_0 = arith.constant 0 : i32
    %c0_i32_1 = arith.constant 0 : i32
    return %arg0, %arg1, %c0_i32, %c0_i32_0 : i32, i32, i32, i32
  }
  func.func @transform_5(%arg0: i32, %arg1: i32) -> (i32, i32, i32, i32) {
    %c0_i32 = arith.constant 0 : i32
    %c0_i32_0 = arith.constant 0 : i32
    %c0_i32_1 = arith.constant 0 : i32
    return %arg0, %arg1, %c0_i32, %c0_i32_0 : i32, i32, i32, i32
  }
}

module attributes {stable_mosaic.version = 11 : i64} {
  func.func @_scale_shift_kernel(%arg0: i32, %arg1: memref<256x128xf32, #tpu.memory_space<vmem>>, %arg2: memref<1x128xf32, #tpu.memory_space<vmem>>, %arg3: memref<1x128xf32, #tpu.memory_space<vmem>>, %arg4: memref<256x128xf32, #tpu.memory_space<vmem>>) attributes {dimension_semantics = [#tpu.dimension_semantics<parallel>], iteration_bounds = array<i64: 1>, scalar_prefetch = 0 : i64, scratch_operands = 0 : i64, tpu.core_type = #tpu.core_type<tc>, window_params = [{transform_indices = @transform_0, window_bounds = array<i64: 256, 128>}, {pipeline_mode = #tpu.pipeline_mode<synchronous>, transform_indices = @transform_1, window_bounds = array<i64: 1, 128>}, {pipeline_mode = #tpu.pipeline_mode<synchronous>, transform_indices = @transform_2, window_bounds = array<i64: 1, 128>}, {transform_indices = @transform_3, window_bounds = array<i64: 256, 128>}]} {
    %c0 = arith.constant 0 : index
    %c0_0 = arith.constant 0 : index
    %0 = vector.load %arg1[%c0, %c0_0] : memref<256x128xf32, #tpu.memory_space<vmem>>, vector<256x128xf32>
    %c0_1 = arith.constant 0 : index
    %c0_2 = arith.constant 0 : index
    %1 = vector.load %arg2[%c0_1, %c0_2] : memref<1x128xf32, #tpu.memory_space<vmem>>, vector<1x128xf32>
    %2 = vector.broadcast %1 : vector<1x128xf32> to vector<256x128xf32>
    %3 = arith.mulf %0, %2 : vector<256x128xf32>
    %c0_3 = arith.constant 0 : index
    %c0_4 = arith.constant 0 : index
    %4 = vector.load %arg3[%c0_3, %c0_4] : memref<1x128xf32, #tpu.memory_space<vmem>>, vector<1x128xf32>
    %5 = vector.broadcast %4 : vector<1x128xf32> to vector<256x128xf32>
    %6 = arith.addf %3, %5 : vector<256x128xf32>
    %c0_5 = arith.constant 0 : index
    %c0_6 = arith.constant 0 : index
    %7 = vector.load %arg4[%c0_5, %c0_6] : memref<256x128xf32, #tpu.memory_space<vmem>>, vector<256x128xf32>
    tpu.vector_store %arg4[%c0_5, %c0_6], %6 {strides = array<i32>} : memref<256x128xf32, #tpu.memory_space<vmem>>, vector<256x128xf32>,
    return
  }
  func.func @transform_0(%arg0: i32) -> (i32, i32) {
    %c0_i32 = arith.constant 0 : i32
    %c0_i32_0 = arith.constant 0 : i32
    return %arg0, %c0_i32 : i32, i32
  }
  func.func @transform_1(%arg0: i32) -> (i32, i32) {
    %c0_i32 = arith.constant 0 : i32
    %c0_i32_0 = arith.constant 0 : i32
    %c0_i32_1 = arith.constant 0 : i32
    return %c0_i32, %c0_i32_0 : i32, i32
  }
  func.func @transform_2(%arg0: i32) -> (i32, i32) {
    %c0_i32 = arith.constant 0 : i32
    %c0_i32_0 = arith.constant 0 : i32
    %c0_i32_1 = arith.constant 0 : i32
    return %c0_i32, %c0_i32_0 : i32, i32
  }
  func.func @transform_3(%arg0: i32) -> (i32, i32) {
    %c0_i32 = arith.constant 0 : i32
    %c0_i32_0 = arith.constant 0 : i32
    return %arg0, %c0_i32 : i32, i32
  }
}

</mosaic_0001>

<bundles_post_ra>
// kernel: module_forward.3
= control target key start
LH: loop header
LB: loop body
LE: loop exit
PB: predicated region body
PF: predicated region fallthrough
CT: control target
= control target key end

     0   :  { %s494_s0 = inlined_call_operand.vmem [shape: f32[324,128], index: 0, kind: input, shape index: {}]   ;;  %s495_s1 = inlined_call_operand.vmem [shape: f32[1,2,128], index: 1, kind: output, shape index: {}]  }
   0x1   :  { %v8_v0 = vld [vmem:[%s494_s0] sm:$0xff]  ;;  %v9_v1 = vld [vmem:[%s494_s0 + $0x8] sm:$0xff]  ;;  %v10_v3 = vld [vmem:[%s494_s0 + $0x10] sm:$0xff] }
   0x2   :  { %v216_v2 = vadd.f32 %v9_v1, %v8_v0  ;;  %v11_v5 = vld [vmem:[%s494_s0 + $0x18] sm:$0xff]  ;;  %v263_v6 = vmul.f32 %v8_v0, %v8_v0  ;;  %v264_v7 = vmul.f32 %v9_v1, %v9_v1  ;;  %v12_v9 = vld [vmem:[%s494_s0 + $0x20] sm:$0xff]  ;;  %v265_v10 = vmul.f32 %v10_v3, %v10_v3  ;;  %v13_v12 = vld [vmem:[%s494_s0 + $0x28] sm:$0xff] }
   0x3   :  { %v266_v13 = vmul.f32 %v11_v5, %v11_v5  ;;  %v14_v16 = vld [vmem:[%s494_s0 + $0x30] sm:$0xff]  ;;  %v267_v17 = vmul.f32 %v12_v9, %v12_v9  ;;  %v15_v20 = vld [vmem:[%s494_s0 + $0x38] sm:$0xff]  ;;  %v268_v21 = vmul.f32 %v13_v12, %v13_v12  ;;  %v16_v24 = vld [vmem:[%s494_s0 + $0x40] sm:$0xff] }
   0x4   :  { %v217_v4 = vadd.f32 %v216_v2, %v10_v3  ;;  %v304_v14 = vadd.f32 %v264_v7, %v263_v6  ;;  %v269_v25 = vmul.f32 %v14_v16, %v14_v16  ;;  %v17_v28 = vld [vmem:[%s494_s0 + $0x48] sm:$0xff]  ;;  %v270_v29 = vmul.f32 %v15_v20, %v15_v20  ;;  %v18_v32 = vld [vmem:[%s494_s0 + $0x50] sm:$0xff]  ;;  %v19_v36 = vld [vmem:[%s494_s0 + $0x58] sm:$0xff] }
   0x5   :  { %v271_v33 = vmul.f32 %v16_v24, %v16_v24  ;;  %v272_v37 = vmul.f32 %v17_v28, %v17_v28  ;;  %v20_v40 = vld [vmem:[%s494_s0 + $0x60] sm:$0xff]  ;;  %v273_v41 = vmul.f32 %v18_v32, %v18_v32  ;;  %v21_v44 = vld [vmem:[%s494_s0 + $0x68] sm:$0xff]  ;;  %v274_v45 = vmul.f32 %v19_v36, %v19_v36  ;;  %v22_v48 = vld [vmem:[%s494_s0 + $0x70] sm:$0xff] }
   0x6   :  { %v218_v8 = vadd.f32 %v217_v4, %v11_v5  ;;  %v305_v18 = vadd.f32 %v304_v14, %v265_v10  ;;  %v275_v49 = vmul.f32 %v20_v40, %v20_v40  ;;  %v23_v52 = vld [vmem:[%s494_s0 + $0x78] sm:$0xff]  ;;  %v276_v53 = vmul.f32 %v21_v44, %v21_v44  ;;  %v24_v56 = vld [vmem:[%s494_s0 + $0x80] sm:$0xff]  ;;  %v25_v60 = vld [vmem:[%s494_s0 + $0x88] sm:$0xff] }
   0x7   :  { %v277_v57 = vmul.f32 %v22_v48, %v22_v48  ;;  %v278_v61 = vmul.f32 %v23_v52, %v23_v52  ;;  %v26_v0 = vld [vmem:[%s494_s0 + $0x90] sm:$0xff]  ;;  %v279_v1 = vmul.f32 %v24_v56, %v24_v56  ;;  %v27_v4 = vld [vmem:[%s494_s0 + $0x98] sm:$0xff]  ;;  %v280_v5 = vmul.f32 %v25_v60, %v25_v60 }
   0x8   :  { %v219_v11 = vadd.f32 %v218_v8, %v12_v9  ;;  %v306_v22 = vadd.f32 %v305_v18, %v266_v13  ;;  %v28_v8 = vld [vmem:[%s494_s0 + $0xa0] sm:$0xff]  ;;  %v281_v9 = vmul.f32 %v26_v0, %v26_v0  ;;  %v282_v13 = vmul.f32 %v27_v4, %v27_v4 }
   0xa   :  { %v220_v15 = vadd.f32 %v219_v11, %v13_v12  ;;  %v307_v26 = vadd.f32 %v306_v22, %v267_v17  ;;  %v29_v12 = vld [vmem:[%s494_s0 + $0xa8] sm:$0xff]  ;;  %v283_v17 = vmul.f32 %v28_v8, %v28_v8 }
   0xc   :  { %v221_v19 = vadd.f32 %v220_v15, %v14_v16  ;;  %v308_v30 = vadd.f32 %v307_v26, %v268_v21  ;;  %v30_v16 = vld [vmem:[%s494_s0 + $0xb0] sm:$0xff]  ;;  %v284_v21 = vmul.f32 %v29_v12, %v29_v12 }
   0xe   :  { %v222_v23 = vadd.f32 %v221_v19, %v15_v20  ;;  %v309_v34 = vadd.f32 %v308_v30, %v269_v25  ;;  %v31_v20 = vld [vmem:[%s494_s0 + $0xb8] sm:$0xff]  ;;  %v285_v25 = vmul.f32 %v30_v16, %v30_v16 }
  0x10   :  { %v223_v27 = vadd.f32 %v222_v23, %v16_v24  ;;  %v310_v38 = vadd.f32 %v309_v34, %v270_v29  ;;  %v32_v24 = vld [vmem:[%s494_s0 + $0xc0] sm:$0xff]  ;;  %v286_v29 = vmul.f32 %v31_v20, %v31_v20 }
  0x12   :  { %v224_v31 = vadd.f32 %v223_v27, %v17_v28  ;;  %v311_v42 = vadd.f32 %v310_v38, %v271_v33  ;;  %v33_v28 = vld [vmem:[%s494_s0 + $0xc8] sm:$0xff]  ;;  %v287_v33 = vmul.f32 %v32_v24, %v32_v24 }
  0x14   :  { %v225_v35 = vadd.f32 %v224_v31, %v18_v32  ;;  %v312_v46 = vadd.f32 %v311_v42, %v272_v37  ;;  %v34_v32 = vld [vmem:[%s494_s0 + $0xd0] sm:$0xff]  ;;  %v288_v37 = vmul.f32 %v33_v28, %v33_v28 }
  0x16   :  { %v226_v39 = vadd.f32 %v225_v35, %v19_v36  ;;  %v313_v50 = vadd.f32 %v312_v46, %v273_v41  ;;  %v35_v36 = vld [vmem:[%s494_s0 + $0xd8] sm:$0xff]  ;;  %v289_v41 = vmul.f32 %v34_v32, %v34_v32 }
  0x18   :  { %v227_v43 = vadd.f32 %v226_v39, %v20_v40  ;;  %v314_v54 = vadd.f32 %v313_v50, %v274_v45  ;;  %v36_v40 = vld [vmem:[%s494_s0 + $0xe0] sm:$0xff]  ;;  %v290_v45 = vmul.f32 %v35_v36, %v35_v36 }
  0x1a   :  { %v228_v47 = vadd.f32 %v227_v43, %v21_v44  ;;  %v315_v58 = vadd.f32 %v314_v54, %v275_v49  ;;  %v37_v44 = vld [vmem:[%s494_s0 + $0xe8] sm:$0xff]  ;;  %v291_v49 = vmul.f32 %v36_v40, %v36_v40 }
  0x1c   :  { %v229_v51 = vadd.f32 %v228_v47, %v22_v48  ;;  %v316_v62 = vadd.f32 %v315_v58, %v276_v53  ;;  %v38_v48 = vld [vmem:[%s494_s0 + $0xf0] sm:$0xff]  ;;  %v292_v53 = vmul.f32 %v37_v44, %v37_v44 }
  0x1e   :  { %v230_v55 = vadd.f32 %v229_v51, %v23_v52  ;;  %v317_v2 = vadd.f32 %v316_v62, %v277_v57  ;;  %v39_v52 = vld [vmem:[%s494_s0 + $0xf8] sm:$0xff]  ;;  %v293_v57 = vmul.f32 %v38_v48, %v38_v48 }
  0x1f   :  { %v294_v62 = vmul.f32 %v39_v52, %v39_v52 }
  0x20   :  { %v231_v59 = vadd.f32 %v230_v55, %v24_v56  ;;  %v318_v6 = vadd.f32 %v317_v2, %v278_v61  ;;  %v40_v56 = vld [vmem:[%s494_s0 + $0x100] sm:$0xff]  ;;  %v41_v61 = vld [vmem:[%s494_s0 + $0x108] sm:$0xff] }
  0x21   :  { %v295_v2 = vmul.f32 %v40_v56, %v40_v56 }
  0x22   :  { %v232_v63 = vadd.f32 %v231_v59, %v25_v60  ;;  %v319_v10 = vadd.f32 %v318_v6, %v279_v1  ;;  %v50_v59 = vlaneseq  ;;  %v42_v1 = vld [vmem:[%s494_s0 + $0x110] sm:$0xff]  ;;  %v43_v6 = vld [vmem:[%s494_s0 + $0x118] sm:$0xff] }
  0x24   :  { %v233_v3 = vadd.f32 %v232_v63, %v26_v0  ;;  %v320_v14 = vadd.f32 %v319_v10, %v280_v5  ;;  %v44_v10 = vld [vmem:[%s494_s0 + $0x120] sm:$0xff] }
  0x26   :  { %v234_v7 = vadd.f32 %v233_v3, %v27_v4  ;;  %v321_v18 = vadd.f32 %v320_v14, %v281_v9  ;;  %v51_v4 = vshrl.u32 %v50_v59, 7 }
  0x28   :  { %v235_v11 = vadd.f32 %v234_v7, %v28_v8  ;;  %v322_v22 = vadd.f32 %v321_v18, %v282_v13  ;;  %v296_v7 = vmul.f32 %v41_v61, %v41_v61  ;;  %v91_v13 = vadd.s32 320, %v51_v4 }
  0x2a   :  { %v236_v15 = vadd.f32 %v235_v11, %v29_v12  ;;  %v323_v26 = vadd.f32 %v322_v22, %v283_v17  ;;  %v297_v11 = vmul.f32 %v42_v1, %v42_v1  ;;  %v48_v22 = vld [vmem:[%s494_s0 + $0x140] sm:$0xff]  ;;  %vm174_vm0 = vcmp.lt.s32.totalorder %v91_v13, 324 }
  0x2c   :  { %v237_v19 = vadd.f32 %v236_v15, %v30_v16  ;;  %v324_v30 = vadd.f32 %v323_v26, %v284_v21  ;;  %v45_v15 = vld [vmem:[%s494_s0 + $0x128] sm:$0xff]  ;;  %v298_v16 = vmul.f32 %v43_v6, %v43_v6 }
  0x2e   :  { %v238_v23 = vadd.f32 %v237_v19, %v31_v20  ;;  %v325_v34 = vadd.f32 %v324_v30, %v285_v25  ;;  %v46_v19 = vld [vmem:[%s494_s0 + $0x130] sm:$0xff]  ;;  %v299_v20 = vmul.f32 %v44_v10, %v44_v10  ;;  %v300_v25 = vmul.f32 %v45_v15, %v45_v15 }
  0x30   :  { %v239_v27 = vadd.f32 %v238_v23, %v32_v24  ;;  %v326_v38 = vadd.f32 %v325_v34, %v286_v29  ;;  %v47_v24 = vld [vmem:[%s494_s0 + $0x138] sm:$0xff]  ;;  %v301_v29 = vmul.f32 %v46_v19, %v46_v19 }
  0x32   :  { %v240_v31 = vadd.f32 %v239_v27, %v33_v28  ;;  %v327_v42 = vadd.f32 %v326_v38, %v287_v33  ;;  %v215_v28 = vsel %vm174_vm0, %v48_v22, 0.0 }
  0x34   :  { %v241_v35 = vadd.f32 %v240_v31, %v34_v32  ;;  %v328_v46 = vadd.f32 %v327_v42, %v288_v37  ;;  %v302_v32 = vmul.f32 %v47_v24, %v47_v24 }
  0x36   :  { %v242_v39 = vadd.f32 %v241_v35, %v35_v36  ;;  %v329_v50 = vadd.f32 %v328_v46, %v289_v41  ;;  %v303_v35 = vmul.f32 %v215_v28, %v215_v28 }
  0x38   :  { %v243_v43 = vadd.f32 %v242_v39, %v36_v40  ;;  %v330_v54 = vadd.f32 %v329_v50, %v290_v45 }
  0x3a   :  { %v244_v47 = vadd.f32 %v243_v43, %v37_v44  ;;  %v331_v58 = vadd.f32 %v330_v54, %v291_v49 }
  0x3c   :  { %v245_v51 = vadd.f32 %v244_v47, %v38_v48  ;;  %v332_v63 = vadd.f32 %v331_v58, %v292_v53 }
  0x3e   :  { %v246_v55 = vadd.f32 %v245_v51, %v39_v52  ;;  %v333_v3 = vadd.f32 %v332_v63, %v293_v57 }
  0x40   :  { %v247_v60 = vadd.f32 %v246_v55, %v40_v56  ;;  %v334_v8 = vadd.f32 %v333_v3, %v294_v62 }
  0x42   :  { %v248_v0 = vadd.f32 %v247_v60, %v41_v61  ;;  %v335_v12 = vadd.f32 %v334_v8, %v295_v2 }
  0x44   :  { %v249_v5 = vadd.f32 %v248_v0, %v42_v1  ;;  %v336_v17 = vadd.f32 %v335_v12, %v296_v7 }
  0x46   :  { %v250_v9 = vadd.f32 %v249_v5, %v43_v6  ;;  %v337_v21 = vadd.f32 %v336_v17, %v297_v11 }
  0x48   :  { %v251_v14 = vadd.f32 %v250_v9, %v44_v10  ;;  %v338_v26 = vadd.f32 %v337_v21, %v298_v16 }
  0x4a   :  { %v252_v18 = vadd.f32 %v251_v14, %v45_v15  ;;  %v339_v30 = vadd.f32 %v338_v26, %v299_v20 }
  0x4c   :  { %v253_v23 = vadd.f32 %v252_v18, %v46_v19  ;;  %v340_v33 = vadd.f32 %v339_v30, %v300_v25 }
  0x4e   :  { %v254_v27 = vadd.f32 %v253_v23, %v47_v24  ;;  %v341_v36 = vadd.f32 %v340_v33, %v301_v29 }
  0x50   :  { %v255_v31 = vadd.f32 %v254_v27, %v215_v28  ;;  %v342_v38 = vadd.f32 %v341_v36, %v302_v32 }
  0x52   :  { %v256_v34 = vrot.slane %v255_v31, 4  ;;  %v343_v40 = vadd.f32 %v342_v38, %v303_v35 }
  0x54   :  { %v257_v37 = vadd.f32 %v256_v34, %v255_v31  ;;  %v344_v42 = vrot.slane %v343_v40, 4 }
  0x56   :  { %v258_v39 = vrot.slane %v257_v37, 2  ;;  %v345_v44 = vadd.f32 %v344_v42, %v343_v40 }
  0x58   :  { %v259_v41 = vadd.f32 %v258_v39, %v257_v37  ;;  %v346_v46 = vrot.slane %v345_v44, 2 }
  0x5a   :  { %v260_v43 = vrot.slane %v259_v41, 1  ;;  %v347_v47 = vadd.f32 %v346_v46, %v345_v44 }
  0x5c   :  { %v261_v45 = vadd.f32 %v260_v43, %v259_v41  ;;  %v348_v48 = vrot.slane %v347_v47, 1 }
  0x5e   :  { %262 = vst [vmem:[%s495_s1] sm:$0x1] %v261_v45  ;;  %v349_v49 = vadd.f32 %v348_v48, %v347_v47 }
  0x60   :  { %350 = vst [vmem:[%s495_s1 + $0x1] sm:$0x1] %v349_v49 }

// kernel: module_forward.5
= control target key start
LH: loop header
LB: loop body
LE: loop exit
PB: predicated region body
PF: predicated region fallthrough
CT: control target
= control target key end

     0   :  { %s448_s0 = inlined_call_operand.vmem [shape: f32[256,128], index: 0, kind: input, shape index: {}]   ;;  %s449_s1 = inlined_call_operand.vmem [shape: f32[1,128], index: 1, kind: input, shape index: {}]   ;;  %s450_s2 = inlined_call_operand.vmem [shape: f32[1,128], index: 2, kind: input, shape index: {}]   ;;  %s451_s3 = inlined_call_operand.vmem [shape: f32[256,128], index: 3, kind: output, shape index: {}]  }
   0x1   :  { %v14_v0 = vld [vmem:[%s448_s0] sm:$0xff]  ;;  %v15_v4 = vld [vmem:[%s448_s0 + $0x8] sm:$0xff]  ;;  %v16_v5 = vld [vmem:[%s448_s0 + $0x10] sm:$0xff] }
   0x2   :  { %v188_v1 = vld [vmem:[%s449_s1] ss:$0 sm:$0xff]  ;;  %v17_v6 = vld [vmem:[%s448_s0 + $0x18] sm:$0xff]  ;;  %v19_v11 = vld [vmem:[%s448_s0 + $0x28] sm:$0xff] }
   0x3   :  { %v193_v2 = vld [vmem:[%s450_s2] ss:$0 sm:$0xff]  ;;  %v53_v3 = vmul.f32 %v188_v1, %v14_v0  ;;  %v54_v7 = vmul.f32 %v188_v1, %v15_v4  ;;  %v55_v8 = vmul.f32 %v188_v1, %v16_v5  ;;  %v56_v9 = vmul.f32 %v188_v1, %v17_v6  ;;  %v20_v12 = vld [vmem:[%s448_s0 + $0x30] sm:$0xff]  ;;  %v21_v17 = vld [vmem:[%s448_s0 + $0x38] sm:$0xff] }
   0x4   :  { %v18_v10 = vld [vmem:[%s448_s0 + $0x20] sm:$0xff]  ;;  %v58_v15 = vmul.f32 %v188_v1, %v19_v11  ;;  %v59_v16 = vmul.f32 %v188_v1, %v20_v12  ;;  %v23_v19 = vld [vmem:[%s448_s0 + $0x48] sm:$0xff]  ;;  %v60_v23 = vmul.f32 %v188_v1, %v21_v17  ;;  %v24_v24 = vld [vmem:[%s448_s0 + $0x50] sm:$0xff] }
   0x5   :  { %v92_v13 = vadd.f32 %v193_v2, %v53_v3  ;;  %v57_v14 = vmul.f32 %v188_v1, %v18_v10  ;;  %v22_v18 = vld [vmem:[%s448_s0 + $0x40] sm:$0xff]  ;;  %v93_v20 = vadd.f32 %v193_v2, %v54_v7  ;;  %v94_v21 = vadd.f32 %v193_v2, %v55_v8  ;;  %v25_v25 = vld [vmem:[%s448_s0 + $0x58] sm:$0xff]  ;;  %v27_v31 = vld [vmem:[%s448_s0 + $0x68] sm:$0xff] }
   0x6   :  { %v95_v22 = vadd.f32 %v193_v2, %v56_v9  ;;  %v26_v26 = vld [vmem:[%s448_s0 + $0x60] sm:$0xff]  ;;  %v97_v28 = vadd.f32 %v193_v2, %v58_v15  ;;  %v98_v29 = vadd.f32 %v193_v2, %v59_v16  ;;  %v61_v30 = vmul.f32 %v188_v1, %v22_v18  ;;  %v28_v32 = vld [vmem:[%s448_s0 + $0x70] sm:$0xff]  ;;  %v29_v33 = vld [vmem:[%s448_s0 + $0x78] sm:$0xff] }
   0x7   :  { %124 = vst [vmem:[%s451_s3] sm:$0xff] %v92_v13  ;;  %v96_v27 = vadd.f32 %v193_v2, %v57_v14  ;;  %125 = vst [vmem:[%s451_s3 + $0x8] sm:$0xff] %v93_v20  ;;  %v99_v34 = vadd.f32 %v193_v2, %v60_v23  ;;  %v62_v35 = vmul.f32 %v188_v1, %v23_v19  ;;  %v30_v38 = vld [vmem:[%s448_s0 + $0x80] sm:$0xff]  ;;  %v31_v43 = vld [vmem:[%s448_s0 + $0x88] sm:$0xff] }
   0x8   :  { %126 = vst [vmem:[%s451_s3 + $0x10] sm:$0xff] %v94_v21  ;;  %127 = vst [vmem:[%s451_s3 + $0x18] sm:$0xff] %v95_v22  ;;  %v63_v36 = vmul.f32 %v188_v1, %v24_v24  ;;  %v64_v37 = vmul.f32 %v188_v1, %v25_v25  ;;  %v100_v39 = vadd.f32 %v193_v2, %v61_v30  ;;  %v32_v44 = vld [vmem:[%s448_s0 + $0x90] sm:$0xff]  ;;  %v33_v45 = vld [vmem:[%s448_s0 + $0x98] sm:$0xff] }
   0x9   :  { %128 = vst [vmem:[%s451_s3 + $0x20] sm:$0xff] %v96_v27  ;;  %129 = vst [vmem:[%s451_s3 + $0x28] sm:$0xff] %v97_v28  ;;  %v65_v40 = vmul.f32 %v188_v1, %v26_v26  ;;  %v66_v41 = vmul.f32 %v188_v1, %v27_v31  ;;  %v67_v42 = vmul.f32 %v188_v1, %v28_v32  ;;  %v34_v50 = vld [vmem:[%s448_s0 + $0xa0] sm:$0xff]  ;;  %v35_v51 = vld [vmem:[%s448_s0 + $0xa8] sm:$0xff] }
   0xa   :  { %130 = vst [vmem:[%s451_s3 + $0x30] sm:$0xff] %v98_v29  ;;  %131 = vst [vmem:[%s451_s3 + $0x38] sm:$0xff] %v99_v34  ;;  %v101_v46 = vadd.f32 %v193_v2, %v62_v35  ;;  %v102_v47 = vadd.f32 %v193_v2, %v63_v36  ;;  %v103_v48 = vadd.f32 %v193_v2, %v64_v37  ;;  %v36_v52 = vld [vmem:[%s448_s0 + $0xb0] sm:$0xff]  ;;  %v37_v57 = vld [vmem:[%s448_s0 + $0xb8] sm:$0xff] }
   0xb   :  { %v68_v49 = vmul.f32 %v188_v1, %v29_v33  ;;  %132 = vst [vmem:[%s451_s3 + $0x40] sm:$0xff] %v100_v39  ;;  %v104_v53 = vadd.f32 %v193_v2, %v65_v40  ;;  %v105_v54 = vadd.f32 %v193_v2, %v66_v41  ;;  %v106_v55 = vadd.f32 %v193_v2, %v67_v42  ;;  %v38_v62 = vld [vmem:[%s448_s0 + $0xc0] sm:$0xff]  ;;  %v39_v5 = vld [vmem:[%s448_s0 + $0xc8] sm:$0xff]  ;;  %v40_v6 = vld [vmem:[%s448_s0 + $0xd0] sm:$0xff] }
   0xc   :  { %v69_v56 = vmul.f32 %v188_v1, %v30_v38  ;;  %133 = vst [vmem:[%s451_s3 + $0x48] sm:$0xff] %v101_v46  ;;  %134 = vst [vmem:[%s451_s3 + $0x50] sm:$0xff] %v102_v47  ;;  %v70_v59 = vmul.f32 %v188_v1, %v31_v43  ;;  %v71_v60 = vmul.f32 %v188_v1, %v32_v44  ;;  %v41_v7 = vld [vmem:[%s448_s0 + $0xd8] sm:$0xff]  ;;  %v42_v12 = vld [vmem:[%s448_s0 + $0xe0] sm:$0xff] }
   0xd   :  { %135 = vst [vmem:[%s451_s3 + $0x58] sm:$0xff] %v103_v48  ;;  %v107_v58 = vadd.f32 %v193_v2, %v68_v49  ;;  %v72_v61 = vmul.f32 %v188_v1, %v33_v45  ;;  %136 = vst [vmem:[%s451_s3 + $0x60] sm:$0xff] %v104_v53  ;;  %v73_v0 = vmul.f32 %v188_v1, %v34_v50  ;;  %v43_v13 = vld [vmem:[%s448_s0 + $0xe8] sm:$0xff]  ;;  %v44_v14 = vld [vmem:[%s448_s0 + $0xf0] sm:$0xff] }
   0xe   :  { %137 = vst [vmem:[%s451_s3 + $0x68] sm:$0xff] %v105_v54  ;;  %138 = vst [vmem:[%s451_s3 + $0x70] sm:$0xff] %v106_v55  ;;  %v108_v63 = vadd.f32 %v193_v2, %v69_v56  ;;  %v74_v3 = vmul.f32 %v188_v1, %v35_v51  ;;  %v75_v4 = vmul.f32 %v188_v1, %v36_v52  ;;  %v45_v19 = vld [vmem:[%s448_s0 + $0xf8] sm:$0xff] }
   0xf   :  { %139 = vst [vmem:[%s451_s3 + $0x78] sm:$0xff] %v107_v58  ;;  %v109_v8 = vadd.f32 %v193_v2, %v70_v59  ;;  %v110_v9 = vadd.f32 %v193_v2, %v71_v60  ;;  %v111_v10 = vadd.f32 %v193_v2, %v72_v61  ;;  %v76_v11 = vmul.f32 %v188_v1, %v37_v57 }
  0x10   :  { %140 = vst [vmem:[%s451_s3 + $0x80] sm:$0xff] %v108_v63  ;;  %v112_v15 = vadd.f32 %v193_v2, %v73_v0  ;;  %v113_v16 = vadd.f32 %v193_v2, %v74_v3  ;;  %v114_v17 = vadd.f32 %v193_v2, %v75_v4  ;;  %v77_v18 = vmul.f32 %v188_v1, %v38_v62 }
  0x11   :  { %141 = vst [vmem:[%s451_s3 + $0x88] sm:$0xff] %v109_v8  ;;  %142 = vst [vmem:[%s451_s3 + $0x90] sm:$0xff] %v110_v9  ;;  %v115_v20 = vadd.f32 %v193_v2, %v76_v11  ;;  %v78_v21 = vmul.f32 %v188_v1, %v39_v5  ;;  %v79_v22 = vmul.f32 %v188_v1, %v40_v6 }
  0x12   :  { %143 = vst [vmem:[%s451_s3 + $0x98] sm:$0xff] %v111_v10  ;;  %v80_v23 = vmul.f32 %v188_v1, %v41_v7  ;;  %144 = vst [vmem:[%s451_s3 + $0xa0] sm:$0xff] %v112_v15  ;;  %v116_v24 = vadd.f32 %v193_v2, %v77_v18  ;;  %v81_v25 = vmul.f32 %v188_v1, %v42_v12 }
  0x13   :  { %145 = vst [vmem:[%s451_s3 + $0xa8] sm:$0xff] %v113_v16  ;;  %146 = vst [vmem:[%s451_s3 + $0xb0] sm:$0xff] %v114_v17  ;;  %v82_v26 = vmul.f32 %v188_v1, %v43_v13  ;;  %v83_v27 = vmul.f32 %v188_v1, %v44_v14  ;;  %v117_v28 = vadd.f32 %v193_v2, %v78_v21 }
  0x14   :  { %147 = vst [vmem:[%s451_s3 + $0xb8] sm:$0xff] %v115_v20  ;;  %v118_v29 = vadd.f32 %v193_v2, %v79_v22  ;;  %v119_v30 = vadd.f32 %v193_v2, %v80_v23  ;;  %v84_v31 = vmul.f32 %v188_v1, %v45_v19  ;;  %148 = vst [vmem:[%s451_s3 + $0xc0] sm:$0xff] %v116_v24 }
  0x15   :  { %v120_v32 = vadd.f32 %v193_v2, %v81_v25  ;;  %v121_v33 = vadd.f32 %v193_v2, %v82_v26  ;;  %v122_v34 = vadd.f32 %v193_v2, %v83_v27  ;;  %149 = vst [vmem:[%s451_s3 + $0xc8] sm:$0xff] %v117_v28 }
  0x16   :  { %150 = vst [vmem:[%s451_s3 + $0xd0] sm:$0xff] %v118_v29  ;;  %151 = vst [vmem:[%s451_s3 + $0xd8] sm:$0xff] %v119_v30  ;;  %v123_v1 = vadd.f32 %v193_v2, %v84_v31 }
  0x17   :  { %152 = vst [vmem:[%s451_s3 + $0xe0] sm:$0xff] %v120_v32  ;;  %153 = vst [vmem:[%s451_s3 + $0xe8] sm:$0xff] %v121_v33 }
  0x18   :  { %154 = vst [vmem:[%s451_s3 + $0xf0] sm:$0xff] %v122_v34  ;;  %155 = vst [vmem:[%s451_s3 + $0xf8] sm:$0xff] %v123_v1 }

// kernel: module_forward.4
= control target key start
LH: loop header
LB: loop body
LE: loop exit
PB: predicated region body
PF: predicated region fallthrough
CT: control target
= control target key end

     0   :  { %s3360_s18 = smov 0   ;;  %s3362_s19 = smov 0   ;;  %s4414_s0 = inlined_call_operand.vmem [shape: f32[2,18,18,64], index: 0, kind: input, shape index: {}]   ;;  %s4415_s1 = inlined_call_operand.vmem [shape: f32[1,64], index: 1, kind: input, shape index: {}]   ;;  %s4416_s2 = inlined_call_operand.vmem [shape: f32[1,64], index: 2, kind: input, shape index: {}]   ;;  %s4417_s3 = inlined_call_operand.vmem [shape: bf16[9,64,64], index: 3, kind: input, shape index: {}]   ;;  %s4418_s4 = inlined_call_operand.vmem [shape: f32[2,16,16,64], index: 4, kind: output, shape index: {0}]   ;;  %s4419_s5 = inlined_call_operand.vmem [shape: f32[2,2,2,64], index: 5, kind: output, shape index: {1}]  }
   0x1   :  { %s3364_s20 = smov 0   ;;  %s3366_s21 = smov 0  }
   0x2   :  { %s3368_s22 = smov 0  }
   0x3 LB: > { %s25_s23 = sadd.s32 1, %s3318_s20  ;;  %s28_s24 = sadd.s32 1, %s3322_s21  ;;  %s3326_s22 = sphi %s3368_s22, %s16_s22   ;;  %s3322_s21 = sphi %s3366_s21, %s4469_s21   ;;  %s3318_s20 = sphi %s3364_s20, %s4468_s20   ;;  %s3314_s19 = sphi %s3362_s19, %s4467_s19   ;;  %s3310_s18 = sphi %s3360_s18, %s4466_s18  }
   0x4   : > { %p26_p0 = scmp.ge.s32.totalorder %s25_s23, 2  ;;  %p2675_p1 = scmp.ge.s32.totalorder %s3326_s22, 1 }
   0x5   : > { %p206_p2 = scmp.lt.s32.totalorder %s3326_s22, 5 }
   0x6   : > { %s4471_s23 = smov (%p26_p0, %s25_s23), 0  ;;  %s4473_s24 = smov (!%p26_p0, %s28_s24), %s3322_s21 }
   0x7   : > { %p207_p3 = pnand %p2675_p1, %p206_p2  ;;  %p30_p4 = scmp.ge.s32.totalorder %s4473_s24, 2 }
   0x9   : > { %s4475_s24 = smov (%p30_p4, %s4473_s24), 0  ;;  %210 = sbr.rel (%p207_p3) target bundleno = 425 (0x1a9), region = 36 }
   0xe   : > { %v3252_v0 = vld [vmem:[%s4417_s3 + $0x38] sm:$0xff]   ;;  %p247_p5 = scmp.lt.s32.totalorder %s3314_s19, 1  ;;  %v3253_v1 = vld [vmem:[%s4417_s3 + $0x30] sm:$0xff]   ;;  %v411_v2 = vlaneseq  ;;  %v3254_v3 = vld [vmem:[%s4417_s3 + $0x28] sm:$0xff]   ;;  %s3405_s7 = sshll.u32 %s3310_s18, 3  ;;  %vm3328_vm0 = vmmov 1  }
   0xf   : > { %3201 = vmatprep.subr.bf16.mxu1 %v3252_v0  ;;  %2985 = vmatprep.subr.bf16.mxu0 %v3252_v0  ;;  %s2684_s11 = smul.u32 192, %s3310_s18  ;;  %vm567_vm1 = vmpackc.low %vm3328_vm0, %vm3328_vm0  ;;  %v3416_v5 = vld [vmem:[%s4415_s1] ss:$0 sm:$0xff]  ;;  %p509_p6 = scmp.ne.s32.totalorder %s3405_s7, 0  ;;  %v3329_v7 = vmov 0   ;;  %v3451_v24 = vld [vmem:[%s4417_s3 + $0x18] sm:$0xff]  }
  0x10   : > { %s4477_s19 = smov (!%p247_p5, %s3314_s19), 1  ;;  %3205 = vmatpush3.bf16.msra.mxu1 %v3252_v0  ;;  %2986 = vmatpush3.bf16.msra.mxu0 %v3252_v0  ;;  %v3407_v4 = vshrl.u32 %v411_v2, 7  ;;  %v3421_v6 = vld [vmem:[%s4416_s2] ss:$0 sm:$0xff]  ;;  %v583_v8 = vsel %vm567_vm1, 65537, %v3329_v7  ;;  %v3462_v30 = vld [vmem:[%s4417_s3 + $0x58] sm:$0xff]  }
  0x11   : > { %3202 = vmatprep.subr.bf16.mxu1 %v3253_v1  ;;  %2987 = vmatprep.subr.bf16.mxu0 %v3253_v1  ;;  %s3209_s6 = smul.u32 432, %s4477_s19  ;;  %v3255_v9 = vld [vmem:[%s4417_s3 + $0x20] sm:$0xff]   ;;  %v2688_v17 = vcombine.low %v583_v8, %v583_v8  ;;  %vm645_vm5 = vsmask.f32 7424  ;;  %vm791_vm8 = vcmask 523264   ;;  %vm1074_vm10 = vcmask 1046528  }
  0x12   : > { %v3431_v10 = vadd.s32 16, %v3407_v4  ;;  %vm415_vm2 = vcmp.ge.s32.totalorder %v3407_v4, 1  ;;  %s510_s26 = scalar_select %p509_p6, 1, 0  ;;  %v3271_v4 = vld [vmem:[%s4417_s3 + $0x80] sm:$0xff]   ;;  %vm2476_vm14 = vcmask 516096  }
  0x13   : > { %s251_s10 = scalar_lea.vmem %s4414_s0, %s3209_s6  ;;  %vm3474_vm7 = vcmp.ne.s16.totalorder %v2688_v17, 0  ;;  %p545_p7 = scmp.ne.s32.totalorder %s3405_s7, 8 }
  0x14   : > { %3206 = vmatpush3.bf16.msra.mxu1 %v3253_v1  ;;  %2988 = vmatpush3.bf16.msra.mxu0 %v3253_v1  ;;  %s3428_s25 = scalar_lea.vmem %s251_s10, %s2684_s11  ;;  %vm420_vm3 = vcmp.le.s32.totalorder %v3431_v10, 16  ;;  %v511_v31 = vstv %s510_s26  ;;  %p255_p8 = scmp.lt.s32.totalorder %s3405_s7, 15 }
  0x15   : > { %3203 = vmatprep.subr.bf16.mxu1 %v3254_v3  ;;  %2989 = vmatprep.subr.bf16.mxu0 %v3254_v3  ;;  %v277_v11 = vld [vmem:[%s3428_s25] sm:$0xff]  ;;  %v278_v12 = vld [vmem:[%s3428_s25 + $0x8] sm:$0xff]  ;;  %v279_v13 = vld [vmem:[%s3428_s25 + $0x10] sm:$0x3]  ;;  %vm512_vm4 = vcmp.eq.s32.totalorder %v511_v31, 1  ;;  %s2679_s26 = sshll.u32 %s4477_s19, 5 }
  0x16   : > { %v315_v14 = vmul.f32 %v3416_v5, %v277_v11  ;;  %v316_v15 = vmul.f32 %v3416_v5, %v278_v12  ;;  %v317_v16 = vmul.f32 %v3416_v5, %v279_v13  ;;  %v289_v18 = vld [vmem:[%s3428_s25 + $0x60] sm:$0xff]  ;;  %v290_v19 = vld [vmem:[%s3428_s25 + $0x68] sm:$0xff]  ;;  %v291_v20 = vld [vmem:[%s3428_s25 + $0x70] sm:$0x3]  ;;  %s546_s6 = scalar_select %p545_p7, 1, 0 }
  0x17   : > { %v327_v21 = vmul.f32 %v3416_v5, %v289_v18  ;;  %v328_v22 = vmul.f32 %v3416_v5, %v290_v19  ;;  %v329_v23 = vmul.f32 %v3416_v5, %v291_v20  ;;  %v280_v28 = vld [vmem:[%s3428_s25 + $0x18] sm:$0xff]  ;;  %v281_v29 = vld [vmem:[%s3428_s25 + $0x20] sm:$0xff]  ;;  %v282_v35 = vld [vmem:[%s3428_s25 + $0x28] sm:$0x3]  ;;  %s4479_s7 = smov (!%p255_p8, %s3405_s7), 15  ;;  %p265_p9 = scmp.lt.s32.totalorder %s3310_s18, 1 }
  0x18   : > { %3207 = vmatpush3.bf16.msra.mxu1 %v3254_v3  ;;  %2990 = vmatpush3.bf16.msra.mxu0 %v3254_v3  ;;  %v351_v25 = vadd.f32 %v3421_v6, %v315_v14  ;;  %v352_v26 = vadd.f32 %v3421_v6, %v316_v15  ;;  %v353_v27 = vadd.f32 %v3421_v6, %v317_v16  ;;  %vm565_vm6 = vmpackc.low %vm512_vm4, %vm512_vm4  ;;  %v292_v60 = vld [vmem:[%s3428_s25 + $0x78] sm:$0xff]  ;;  %v293_v1 = vld [vmem:[%s3428_s25 + $0x80] sm:$0xff]  ;;  %s2678_s17 = sshll.u32 %s4479_s7, 1 }
  0x19   : > { %3204 = vmatprep.subr.bf16.mxu1 %v3255_v9  ;;  %2991 = vmatprep.subr.bf16.mxu0 %v3255_v9  ;;  %v363_v32 = vadd.f32 %v3421_v6, %v327_v21  ;;  %v364_v33 = vadd.f32 %v3421_v6, %v328_v22  ;;  %v365_v34 = vadd.f32 %v3421_v6, %v329_v23  ;;  %v581_v45 = vsel %vm565_vm6, 65537, %v3329_v7  ;;  %v294_v11 = vld [vmem:[%s3428_s25 + $0x88] sm:$0x3]  ;;  %v284_v31 = vld [vmem:[%s3428_s25 + $0x38] sm:$0xff]  ;;  %s259_s27 = sadd.s32 %s2679_s26, %s2678_s17  ;;  %s4481_s18 = smov (!%p265_p9, %s3310_s18), 1 }
  0x1a   : > { %v381_v36 = vmax.f32 %v351_v25, 0.0  ;;  %v382_v37 = vmax.f32 %v352_v26, 0.0  ;;  %v383_v38 = vmax.f32 %v353_v27, 0.0  ;;  %v318_v42 = vmul.f32 %v3416_v5, %v280_v28  ;;  %v283_v25 = vld [vmem:[%s3428_s25 + $0x30] sm:$0xff]  ;;  %s2680_s7 = sshll.u32 %s259_s27, 3 }
  0x1b   : > { %v393_v39 = vmax.f32 %v363_v32, 0.0  ;;  %v394_v40 = vmax.f32 %v364_v33, 0.0  ;;  %v395_v41 = vmax.f32 %v365_v34, 0.0  ;;  %v319_v47 = vmul.f32 %v3416_v5, %v281_v29  ;;  %v285_v32 = vld [vmem:[%s3428_s25 + $0x40] sm:$0x3]  ;;  %s4283_s30 = scalar_lea.vmem %s4418_s4, %s2680_s7 }
  0x1c   : > { %3208 = vmatpush3.bf16.msra.mxu1 %v3255_v9  ;;  %2992 = vmatpush3.bf16.msra.mxu0 %v3255_v9  ;;  %v430_v43 = vsel %vm415_vm2, %v381_v36, 0.0  ;;  %v432_v44 = vsel %vm420_vm3, %v383_v38, 0.0  ;;  %v2687_v50 = vcombine.low %v581_v45, %v581_v45  ;;  %v320_v54 = vmul.f32 %v3416_v5, %v282_v35 }
  0x1d   : > { %3009 = vmatprep.subr.bf16.mxu1 %v3451_v24  ;;  %3033 = vmatprep.subr.bf16.mxu0 %v3462_v30  ;;  %v3481_v48 = vpack.c.bf16 %v382_v37, %v430_v43  ;;  %v3483_v49 = vpack.c.bf16 %v432_v44, %v432_v44  ;;  %v442_v51 = vsel %vm415_vm2, %v393_v39, 0.0  ;;  %v444_v52 = vsel %vm420_vm3, %v395_v41, 0.0  ;;  %v295_v44 = vld [vmem:[%s3428_s25 + $0x90] sm:$0xff] }
  0x1e   : > { %v3489_v53 = vpack.c.bf16 %v394_v40, %v442_v51  ;;  %v354_v55 = vadd.f32 %v3421_v6, %v318_v42  ;;  %vm3493_vm9 = vcmp.ne.s16.totalorder %v2687_v50, 0  ;;  %v3501_v61 = vpack.c.bf16 %v444_v52, %v444_v52 }
  0x1f   : > { %v647_v57 = vshrl.u32 %v3481_v48, 16  ;;  %v649_v58 = vshll.u32 %v3481_v48, 16  ;;  %v654_v59 = vshll.u32 %v3483_v49, 16  ;;  %v355_v0 = vadd.f32 %v3421_v6, %v319_v47 }
  0x20   : > { %v695_v62 = vshrl.u32 %v3489_v53, 16  ;;  %v697_v63 = vshll.u32 %v3489_v53, 16  ;;  %v356_v8 = vadd.f32 %v3421_v6, %v320_v54  ;;  %v384_v9 = vmax.f32 %v354_v55, 0.0 }
  0x21   : > { %v651_v2 = vrot.slane %v649_v58, 1  ;;  %v656_v3 = vrot.slane %v654_v59, 1  ;;  %v702_v13 = vshll.u32 %v3501_v61, 16  ;;  %v385_v14 = vmax.f32 %v355_v0, 0.0  ;;  %v296_v58 = vld [vmem:[%s3428_s25 + $0x98] sm:$0xff] }
  0x22   : > { %v699_v12 = vrot.slane %v697_v63, 1  ;;  %v330_v15 = vmul.f32 %v3416_v5, %v292_v60  ;;  %v386_v17 = vmax.f32 %v356_v8, 0.0  ;;  %v433_v18 = vsel %vm415_vm2, %v384_v9, 0.0  ;;  %v297_v59 = vld [vmem:[%s3428_s25 + $0xa0] sm:$0x3]  ;;  %v3259_v63 = vld [vmem:[%s4417_s3 + $0x50] sm:$0xff]  }
  0x23   : > { %v652_v16 = vor.u32 %v651_v2, %v647_v57  ;;  %v331_v19 = vmul.f32 %v3416_v5, %v293_v1  ;;  %v704_v21 = vrot.slane %v702_v13, 1  ;;  %v3514_v22 = vpack.c.bf16 %v385_v14, %v433_v18 }
  0x24   : > { %v700_v20 = vor.u32 %v699_v12, %v695_v62  ;;  %v332_v23 = vmul.f32 %v3416_v5, %v294_v11  ;;  %v435_v27 = vsel %vm420_vm3, %v386_v17, 0.0  ;;  %v366_v28 = vadd.f32 %v3421_v6, %v330_v15 }
  0x25   : > { %v657_v26 = vsel %vm645_vm5, %v652_v16, %v656_v3  ;;  %v367_v29 = vadd.f32 %v3421_v6, %v331_v19  ;;  %v3530_v35 = vpack.c.bf16 %v435_v27, %v435_v27  ;;  %v659_v36 = vshrl.u32 %v3514_v22, 16  ;;  %v286_v19 = vld [vmem:[%s3428_s25 + $0x48] sm:$0xff]  ;;  %v288_v27 = vld [vmem:[%s3428_s25 + $0x58] sm:$0x3] }
  0x26   : > { %v750_v33 = vsel %vm3493_vm9, %v657_v26, 0  ;;  %v3528_v34 = vsel %vm645_vm5, %v700_v20, %v704_v21  ;;  %v661_v38 = vshll.u32 %v3514_v22, 16  ;;  %v368_v39 = vadd.f32 %v3421_v6, %v332_v23  ;;  %v287_v26 = vld [vmem:[%s3428_s25 + $0x50] sm:$0xff] }
  0x27   : > { %2993 = vmatprep.mubr.msk.bf16.mxu0 %vm791_vm8, %v750_v33  ;;  %v3537_v37 = vsel %vm3474_vm7, %v3528_v34, 0  ;;  %v396_v40 = vmax.f32 %v366_v28, 0.0  ;;  %v666_v41 = vshll.u32 %v3530_v35, 16  ;;  %v397_v42 = vmax.f32 %v367_v29, 0.0  ;;  %v3261_v28 = vld [vmem:[%s4417_s3 + $0x48] sm:$0xff]  }
  0x28   : > { %3001 = vmatprep.mubr.msk.bf16.mxu1 %vm791_vm8, %v3537_v37  ;;  %v321_v43 = vmul.f32 %v3416_v5, %v283_v25  ;;  %v663_v45 = vrot.slane %v661_v38, 1  ;;  %v398_v47 = vmax.f32 %v368_v39, 0.0  ;;  %v322_v51 = vmul.f32 %v3416_v5, %v284_v31 }
  0x29   : > { %v445_v50 = vsel %vm415_vm2, %v396_v40, 0.0  ;;  %v668_v52 = vrot.slane %v666_v41, 1  ;;  %v323_v55 = vmul.f32 %v3416_v5, %v285_v32  ;;  %v333_v1 = vmul.f32 %v3416_v5, %v295_v44  ;;  %v3258_v32 = vld [vmem:[%s4417_s3 + $0x10] sm:$0xff]  }
  0x2a   : > { %v3549_v54 = vpack.c.bf16 %v397_v42, %v445_v50  ;;  %v357_v57 = vadd.f32 %v3421_v6, %v321_v43  ;;  %v664_v60 = vor.u32 %v663_v45, %v659_v36  ;;  %v447_v62 = vsel %vm420_vm3, %v398_v47, 0.0  ;;  %v298_v45 = vld [vmem:[%s3428_s25 + $0xa8] sm:$0xff]  ;;  %v299_v47 = vld [vmem:[%s3428_s25 + $0xb0] sm:$0xff] }
  0x2b   : > { %v358_v0 = vadd.f32 %v3421_v6, %v322_v51  ;;  %v3562_v2 = vpack.c.bf16 %v447_v62, %v447_v62  ;;  %v359_v9 = vadd.f32 %v3421_v6, %v323_v55  ;;  %v334_v14 = vmul.f32 %v3416_v5, %v296_v58 }
  0x2c   : > { %v707_v3 = vshrl.u32 %v3549_v54, 16  ;;  %v709_v8 = vshll.u32 %v3549_v54, 16  ;;  %v3568_v11 = vsel %vm645_vm5, %v664_v60, %v668_v52  ;;  %v387_v12 = vmax.f32 %v357_v57, 0.0  ;;  %v300_v57 = vld [vmem:[%s3428_s25 + $0xb8] sm:$0x3] }
  0x2d   : > { %v388_v13 = vmax.f32 %v358_v0, 0.0  ;;  %v751_v15 = vsel %vm3474_vm7, %v3568_v11, 0  ;;  %v714_v17 = vshll.u32 %v3562_v2, 16  ;;  %v389_v18 = vmax.f32 %v359_v9, 0.0  ;;  %v3263_v0 = vld [vmem:[%s4417_s3 + $0x40] sm:$0xff]  }
  0x2e   : > { %v711_v16 = vrot.slane %v709_v8, 1  ;;  %2994 = vmatmul.mubr.msk.bf16.vlgmr.msra.gmra.mxu0 %vm791_vm8, %v751_v15  ;;  %v436_v20 = vsel %vm415_vm2, %v387_v12, 0.0  ;;  %v335_v21 = vmul.f32 %v3416_v5, %v297_v59  ;;  %v369_v23 = vadd.f32 %v3421_v6, %v333_v1 }
  0x2f   : > { %v370_v25 = vadd.f32 %v3421_v6, %v334_v14  ;;  %v716_v31 = vrot.slane %v714_v17, 1  ;;  %3034 = vmatpush3.bf16.msra.mxu0 %v3462_v30  ;;  %v438_v33 = vsel %vm420_vm3, %v389_v18, 0.0  ;;  %v3593_v36 = vpack.c.bf16 %v388_v13, %v436_v20 }
  0x30   : > { %v712_v29 = vor.u32 %v711_v16, %v707_v3  ;;  %3035 = vmatprep.subr.bf16.mxu0 %v3259_v63  ;;  %v3595_v38 = vpack.c.bf16 %v438_v33, %v438_v33  ;;  %v371_v39 = vadd.f32 %v3421_v6, %v335_v21  ;;  %v399_v40 = vmax.f32 %v369_v23, 0.0 }
  0x31   : > { %v400_v41 = vmax.f32 %v370_v25, 0.0  ;;  %v671_v30 = vshrl.u32 %v3593_v36, 16  ;;  %v673_v43 = vshll.u32 %v3593_v36, 16  ;;  %v324_v44 = vmul.f32 %v3416_v5, %v286_v19 }
  0x32   : > { %v3599_v42 = vsel %vm645_vm5, %v712_v29, %v716_v31  ;;  %v678_v51 = vshll.u32 %v3595_v38, 16  ;;  %v401_v52 = vmax.f32 %v371_v39, 0.0  ;;  %v448_v55 = vsel %vm415_vm2, %v399_v40, 0.0  ;;  %v3654_v31 = vld [vmem:[%s4417_s3 + $0x98] sm:$0xff]   ;;  %v3262_v40 = vld [vmem:[%s4417_s3] sm:$0xff]  }
  0x33   : > { %v3609_v50 = vsel %vm3474_vm7, %v3599_v42, 0  ;;  %3036 = vmatpush3.bf16.msra.mxu0 %v3259_v63  ;;  %v675_v58 = vrot.slane %v673_v43, 1  ;;  %v3617_v59 = vpack.c.bf16 %v400_v41, %v448_v55  ;;  %v325_v60 = vmul.f32 %v3416_v5, %v287_v26 }
  0x34   : > { %3002 = vmatmul.mubr.msk.bf16.vlgmr.msra.gmra.mxu1 %vm791_vm8, %v3609_v50  ;;  %v326_v62 = vmul.f32 %v3416_v5, %v288_v27  ;;  %v680_v1 = vrot.slane %v678_v51, 1  ;;  %v450_v3 = vsel %vm420_vm3, %v401_v52, 0.0  ;;  %v360_v8 = vadd.f32 %v3421_v6, %v324_v44  ;;  %3037 = vmatprep.subr.bf16.mxu0 %v3261_v28  ;;  %v3676_v52 = vld [vmem:[%s4417_s3 + $0x78] sm:$0xff]  }
  0x35   : > { %3010 = vmatpush3.bf16.msra.mxu1 %v3451_v24  ;;  %v336_v63 = vmul.f32 %v3416_v5, %v298_v45  ;;  %v676_v9 = vor.u32 %v675_v58, %v671_v30  ;;  %v3629_v12 = vpack.c.bf16 %v450_v3, %v450_v3  ;;  %v719_v13 = vshrl.u32 %v3617_v59, 16  ;;  %v3260_v24 = vld [vmem:[%s4417_s3 + $0x8] sm:$0xff]  }
  0x36   : > { %3011 = vmatprep.subr.bf16.mxu1 %v3258_v32  ;;  %v721_v14 = vshll.u32 %v3617_v59, 16  ;;  %v361_v15 = vadd.f32 %v3421_v6, %v325_v60  ;;  %v362_v16 = vadd.f32 %v3421_v6, %v326_v62  ;;  %v390_v17 = vmax.f32 %v360_v8, 0.0 }
  0x37   : > { %v337_v18 = vmul.f32 %v3416_v5, %v299_v47  ;;  %v3640_v19 = vsel %vm645_vm5, %v676_v9, %v680_v1  ;;  %v726_v21 = vshll.u32 %v3629_v12, 16  ;;  %v338_v23 = vmul.f32 %v3416_v5, %v300_v57  ;;  %3038 = vmatpush3.bf16.msra.mxu0 %v3261_v28 }
  0x38   : > { %v723_v20 = vrot.slane %v721_v14, 1  ;;  %v3647_v25 = vsel %vm3474_vm7, %v3640_v19, 0  ;;  %v391_v26 = vmax.f32 %v361_v15, 0.0  ;;  %v392_v27 = vmax.f32 %v362_v16, 0.0  ;;  %3039 = vmatprep.subr.bf16.mxu0 %v3263_v0 }
  0x39   : > { %3012 = vmatpush3.bf16.msra.mxu1 %v3258_v32  ;;  %v439_v29 = vsel %vm415_vm2, %v390_v17, 0.0  ;;  %2997 = vmatprep.mubr.msk.bf16.mxu0 %vm791_vm8, %v3647_v25  ;;  %v728_v32 = vrot.slane %v726_v21, 1  ;;  %v372_v33 = vadd.f32 %v3421_v6, %v336_v63  ;;  %v373_v39 = vadd.f32 %v3421_v6, %v337_v18 }
  0x3a   : > { %v724_v28 = vor.u32 %v723_v20, %v719_v13  ;;  %3013 = vmatprep.subr.bf16.mxu1 %v3260_v24  ;;  %v441_v41 = vsel %vm420_vm3, %v392_v27, 0.0  ;;  %v3665_v30 = vpack.c.bf16 %v391_v26, %v439_v29  ;;  %v374_v43 = vadd.f32 %v3421_v6, %v338_v23 }
  0x3b   : > { %v3671_v45 = vpack.c.bf16 %v441_v41, %v441_v41  ;;  %v402_v47 = vmax.f32 %v372_v33, 0.0  ;;  %v403_v51 = vmax.f32 %v373_v39, 0.0  ;;  %3040 = vmatpush3.bf16.msra.mxu0 %v3263_v0  ;;  %v1075_v1 = vrot.slane %v3481_v48, 1 }
  0x3c   : > { %v3669_v44 = vsel %vm645_vm5, %v724_v28, %v728_v32  ;;  %v683_v57 = vshrl.u32 %v3665_v30, 16  ;;  %v685_v58 = vshll.u32 %v3665_v30, 16  ;;  %v404_v60 = vmax.f32 %v374_v43, 0.0  ;;  %3081 = vmatprep.subr.bf16.mxu0 %v3654_v31 }
  0x3d   : > { %v3681_v55 = vsel %vm3474_vm7, %v3669_v44, 0  ;;  %3014 = vmatpush3.bf16.msra.mxu1 %v3260_v24  ;;  %v690_v62 = vshll.u32 %v3671_v45, 16  ;;  %v451_v0 = vsel %vm415_vm2, %v402_v47, 0.0  ;;  %v1076_v3 = vrot.slane %v3483_v49, 1 }
  0x3e   : > { %3005 = vmatprep.mubr.msk.bf16.mxu1 %vm791_vm8, %v3681_v55  ;;  %3015 = vmatprep.subr.bf16.mxu1 %v3262_v40  ;;  %v687_v8 = vrot.slane %v685_v58, 1  ;;  %v453_v63 = vsel %vm420_vm3, %v404_v60, 0.0  ;;  %v3695_v9 = vpack.c.bf16 %v403_v51, %v451_v0  ;;  %v1079_v18 = vrot.slane %v3530_v35, 1  ;;  %v303_v51 = vld [vmem:[%s3428_s25 + $0xd0] sm:$0x3]  ;;  %v302_v60 = vld [vmem:[%s3428_s25 + $0xc8] sm:$0xff] }
  0x3f   : > { %v692_v13 = vrot.slane %v690_v62, 1  ;;  %v3697_v14 = vpack.c.bf16 %v453_v63, %v453_v63  ;;  %v1077_v24 = vsel %vm1074_vm10, %v1075_v1, %v1076_v3  ;;  %v1078_v21 = vrot.slane %v3514_v22, 1  ;;  %v304_v0 = vld [vmem:[%s3428_s25 + $0xd8] sm:$0xff]  ;;  %v305_v1 = vld [vmem:[%s3428_s25 + $0xe0] sm:$0xff] }
  0x40   : > { %v688_v15 = vor.u32 %v687_v8, %v683_v57  ;;  %v731_v16 = vshrl.u32 %v3695_v9, 16  ;;  %v733_v17 = vshll.u32 %v3695_v9, 16  ;;  %v1107_v20 = vsel %vm3493_vm9, %v1077_v24, 0  ;;  %v3267_v24 = vld [vmem:[%s4417_s3 + $0x90] sm:$0xff]  }
  0x41   : > { %3016 = vmatpush3.bf16.msra.mxu1 %v3262_v40  ;;  %v738_v49 = vshll.u32 %v3697_v14, 16  ;;  %v1081_v27 = vrot.slane %v3593_v36, 1  ;;  %v1082_v35 = vrot.slane %v3595_v38, 1  ;;  %v3722_v33 = vsel %vm1074_vm10, %v1078_v21, %v1079_v18  ;;  %v301_v40 = vld [vmem:[%s3428_s25 + $0xc0] sm:$0xff] }
  0x42   : > { %3057 = vmatprep.subr.bf16.mxu1 %v3676_v52  ;;  %v3709_v23 = vsel %vm645_vm5, %v688_v15, %v692_v13  ;;  %v735_v26 = vrot.slane %v733_v17, 1  ;;  %v1084_v39 = vrot.slane %v3665_v30, 1  ;;  %v1085_v38 = vrot.slane %v3671_v45, 1 }
  0x43   : > { %v3716_v29 = vsel %vm3474_vm7, %v3709_v23, 0  ;;  %v740_v28 = vrot.slane %v738_v49, 1  ;;  %v629_v43 = vsel %vm3493_vm9, %v3481_v48, 0  ;;  %v3734_v47 = vsel %vm1074_vm10, %v1081_v27, %v1082_v35  ;;  %v306_v49 = vld [vmem:[%s3428_s25 + $0xe8] sm:$0x3] }
  0x44   : > { %2998 = vmatmul.mubr.msk.bf16.gmra.mxu0 %vm791_vm8, %v3716_v29  ;;  %v736_v32 = vor.u32 %v735_v26, %v731_v16  ;;  %v1087_v45 = vrot.slane %v3489_v53, 1  ;;  %v1088_v58 = vrot.slane %v3501_v61, 1  ;;  %v630_v48 = vsel %vm3474_vm7, %v3514_v22, 0 }
  0x45   : > { %3041 = vmatprep.mubr.msk.bf16.mxu0 %vm791_vm8, %v1107_v20  ;;  %v1108_v56 = vsel %vm3474_vm7, %v3722_v33, 0  ;;  %v3757_v62 = vsel %vm3474_vm7, %v3593_v36, 0  ;;  %v3762_v61 = vsel %vm3474_vm7, %v3665_v30, 0  ;;  %v3770_v3 = vsel %vm3474_vm7, %v3734_v47, 0 }
  0x46   : > { %v3728_v41 = vsel %vm645_vm5, %v736_v32, %v740_v28  ;;  %v3773_v8 = vsel %vm1074_vm10, %v1084_v39, %v1085_v38  ;;  %v3778_v63 = vsel %vm3474_vm7, %v3489_v53, 0  ;;  %v1090_v13 = vrot.slane %v3549_v54, 1 }
  0x47   : > { %v3741_v57 = vsel %vm3474_vm7, %v3728_v41, 0  ;;  %v1091_v15 = vrot.slane %v3562_v2, 1  ;;  %v339_v16 = vmul.f32 %v3416_v5, %v301_v40  ;;  %v340_v17 = vmul.f32 %v3416_v5, %v302_v60  ;;  %v3269_v60 = vld [vmem:[%s4417_s3 + $0x88] sm:$0xff]  }
  0x48   : > { %3006 = vmatmul.mubr.msk.bf16.gmra.mxu1 %vm791_vm8, %v3741_v57  ;;  %v341_v18 = vmul.f32 %v3416_v5, %v303_v51  ;;  %v3792_v20 = vsel %vm1074_vm10, %v1087_v45, %v1088_v58  ;;  %v1093_v21 = vrot.slane %v3617_v59, 1  ;;  %v342_v26 = vmul.f32 %v3416_v5, %v304_v0 }
  0x49   : > { %3017 = vmatprep.mubr.msk.bf16.mxu1 %vm791_vm8, %v629_v43  ;;  %v343_v27 = vmul.f32 %v3416_v5, %v305_v1  ;;  %v1094_v2 = vrot.slane %v3629_v12, 1  ;;  %v375_v35 = vadd.f32 %v3421_v6, %v339_v16  ;;  %v376_v28 = vadd.f32 %v3421_v6, %v340_v17  ;;  %v3266_v12 = vld [vmem:[%s4417_s3 + $0x70] sm:$0xff]  }
  0x4a   : > { %v377_v32 = vadd.f32 %v3421_v6, %v341_v18  ;;  %v378_v39 = vadd.f32 %v3421_v6, %v342_v26  ;;  %v547_v40 = vstv %s546_s6  ;;  %v344_v43 = vmul.f32 %v3416_v5, %v306_v49  ;;  %s2681_s6 = sshll.u32 %s4477_s19, 1 }
  0x4b   : > { %v379_v38 = vadd.f32 %v3421_v6, %v343_v27  ;;  %v405_v51 = vmax.f32 %v375_v35, 0.0  ;;  %v406_v45 = vmax.f32 %v376_v28, 0.0  ;;  %vm548_vm11 = vcmp.eq.s32.totalorder %v547_v40, 1  ;;  %v3268_v27 = vld [vmem:[%s4417_s3 + $0x68] sm:$0xff]   ;;  %s268_s8 = sadd.s32 %s2681_s6, %s4481_s18 }
  0x4c   : > { %3042 = vmatmul.mubr.msk.bf16.vlgmr.msra.gmra.mxu0 %vm791_vm8, %v1108_v56  ;;  %v407_v58 = vmax.f32 %v377_v32, 0.0  ;;  %v408_v56 = vmax.f32 %v378_v39, 0.0  ;;  %vm1818_vm12 = vmpackc.low %vm548_vm11, %vm548_vm11  ;;  %v380_v0 = vadd.f32 %v3421_v6, %v344_v43  ;;  %v3824_v1 = vsel %vm3474_vm7, %v3792_v20, 0  ;;  %s2682_s9 = sshll.u32 %s268_s8, 1 }
  0x4d   : > { %3082 = vmatpush3.bf16.msra.mxu0 %v3654_v31  ;;  %3045 = vmatprep.mubr.msk.bf16.mxu0 %vm791_vm8, %v3770_v3  ;;  %v3814_v31 = vsel %vm3474_vm7, %v3773_v8, 0  ;;  %v409_v5 = vmax.f32 %v379_v38, 0.0  ;;  %v454_v16 = vsel %vm415_vm2, %v405_v51, 0.0  ;;  %v1834_v18 = vsel %vm1818_vm12, 65537, %v3329_v7  ;;  %s270_s11 = scalar_lea.vmem %s4419_s5, %s2682_s9 }
  0x4e   : > { %3083 = vmatprep.subr.bf16.mxu0 %v3267_v24  ;;  %v456_v17 = vsel %vm420_vm3, %v407_v58, 0.0  ;;  %v3834_v6 = vpack.c.bf16 %v406_v45, %v454_v16  ;;  %v457_v49 = vsel %vm415_vm2, %v408_v56, 0.0  ;;  %v2814_v26 = vcombine.low %v1834_v18, %v1834_v18  ;;  %v3270_v58 = vld [vmem:[%s4417_s3 + $0x60] sm:$0xff]  }
  0x4f   : > { %v3842_v7 = vsel %vm1074_vm10, %v1090_v13, %v1091_v15  ;;  %v3847_v35 = vpack.c.bf16 %v409_v5, %v457_v49  ;;  %v410_v28 = vmax.f32 %v380_v0, 0.0  ;;  %v3273_v0 = vld [vmem:[%s4417_s3 + $0xd8] sm:$0xff]   ;;  %v1096_v49 = vrot.slane %v3695_v9, 1 }
  0x50   : > { %3018 = vmatmul.mubr.msk.bf16.vlgmr.msra.gmra.mxu1 %vm791_vm8, %v630_v48  ;;  %v477_v48 = vpack.c.bf16 %v456_v17, %v456_v17  ;;  %v1450_v32 = vshll.u32 %v3834_v6, 16  ;;  %v1874_v13 = vsel %vm3474_vm7, %v3834_v6, 0  ;;  %v1631_v15 = vrot.slane %v3834_v6, 1 }
  0x51   : > { %3058 = vmatpush3.bf16.msra.mxu1 %v3676_v52  ;;  %3021 = vmatprep.mubr.msk.bf16.mxu1 %vm791_vm8, %v3757_v62  ;;  %v3845_v52 = vsel %vm1074_vm10, %v1093_v21, %v1094_v2  ;;  %vm3860_vm13 = vcmp.ne.s16.totalorder %v2814_v26, 0  ;;  %v459_v38 = vsel %vm420_vm3, %v410_v28, 0.0  ;;  %v2049_v56 = vshll.u32 %v3847_v35, 16 }
  0x52   : > { %3059 = vmatprep.subr.bf16.mxu1 %v3266_v12  ;;  %3084 = vmatpush3.bf16.msra.mxu0 %v3267_v24  ;;  %v1448_v24 = vshrl.u32 %v3834_v6, 16  ;;  %v1455_v39 = vshll.u32 %v477_v48, 16  ;;  %v1632_v21 = vrot.slane %v477_v48, 1  ;;  %v1452_v40 = vrot.slane %v1450_v32, 1 }
  0x53   : > { %3085 = vmatprep.subr.bf16.mxu0 %v3269_v60  ;;  %v1875_v51 = vsel %vm3860_vm13, %v3847_v35, 0  ;;  %v479_v45 = vpack.c.bf16 %v459_v38, %v459_v38  ;;  %v2240_v5 = vrot.slane %v3847_v35, 1  ;;  %v3891_v48 = vsel %vm3474_vm7, %v3842_v7, 0 }
  0x54   : > { %3046 = vmatmul.mubr.msk.bf16.gmra.mxu0 %vm791_vm8, %v3814_v31  ;;  %v1457_v43 = vrot.slane %v1455_v39, 1  ;;  %v3875_v10 = vsel %vm1074_vm10, %v1631_v15, %v1632_v21  ;;  %v1453_v16 = vor.u32 %v1452_v40, %v1448_v24  ;;  %v2051_v26 = vrot.slane %v2049_v56, 1 }
  0x55   : > { %3060 = vmatpush3.bf16.msra.mxu1 %v3266_v12  ;;  %3049 = vmatprep.mubr.msk.bf16.mxu0 %vm791_vm8, %v3824_v1  ;;  %v2047_v12 = vshrl.u32 %v3847_v35, 16  ;;  %v2054_v17 = vshll.u32 %v479_v45, 16  ;;  %v2241_v18 = vrot.slane %v479_v45, 1  ;;  %v1097_v28 = vrot.slane %v3697_v14, 1 }
  0x56   : > { %3061 = vmatprep.subr.bf16.mxu1 %v3268_v27  ;;  %3086 = vmatpush3.bf16.msra.mxu0 %v3269_v60  ;;  %v2251_v60 = vsel %vm3474_vm7, %v3875_v10, 0  ;;  %v3898_v24 = vsel %vm645_vm5, %v1453_v16, %v1457_v43  ;;  %v3906_v15 = vsel %vm3474_vm7, %v3845_v52, 0  ;;  %v3935_v45 = vsel %vm3474_vm7, %v3617_v59, 0 }
  0x57   : > { %3087 = vmatprep.subr.bf16.mxu0 %v3271_v4  ;;  %v2056_v32 = vrot.slane %v2054_v17, 1  ;;  %v3901_v39 = vsel %vm1074_vm10, %v2240_v5, %v2241_v18  ;;  %v2066_v14 = vsel %vm3474_vm7, %v3898_v24, 0  ;;  %v2052_v21 = vor.u32 %v2051_v26, %v2047_v12  ;;  %v3275_v5 = vld [vmem:[%s4417_s3 + $0xd0] sm:$0xff]  }
  0x58   : > { %3022 = vmatmul.mubr.msk.bf16.gmra.mxu1 %vm791_vm8, %v3762_v61  ;;  %v2252_v38 = vsel %vm3860_vm13, %v3901_v39, 0  ;;  %v3938_v12 = vsel %vm1074_vm10, %v1096_v49, %v1097_v28  ;;  %v3954_v56 = vsel %vm3474_vm7, %v3695_v9, 0 }
  0x59   : > { %3025 = vmatprep.mubr.msk.bf16.mxu1 %vm791_vm8, %v3778_v63  ;;  %3062 = vmatpush3.bf16.msra.mxu1 %v3268_v27  ;;  %v3272_v27 = vld [vmem:[%s4417_s3 + $0xb8] sm:$0xff]   ;;  %v3920_v40 = vsel %vm645_vm5, %v2052_v21, %v2056_v32 }
  0x5a   : > { %3063 = vmatprep.subr.bf16.mxu1 %v3270_v58  ;;  %3088 = vmatpush3.bf16.msra.mxu0 %v3271_v4  ;;  %v3925_v4 = vsel %vm3474_vm7, %v3549_v54, 0  ;;  %v2067_v43 = vsel %vm3860_vm13, %v3920_v40, 0 }
  0x5b   : > { %3129 = vmatprep.subr.bf16.mxu0 %v3273_v0 }
  0x5c   : > { %3050 = vmatmul.mubr.msk.bf16.gmra.mxu0 %vm791_vm8, %v3891_v48 }
  0x5d   : > { %3053 = vmatprep.mubr.msk.bf16.mxu0 %vm791_vm8, %v3906_v15  ;;  %3064 = vmatpush3.bf16.msra.mxu1 %v3270_v58  ;;  %v3947_v58 = vsel %vm3474_vm7, %v3938_v12, 0 }
  0x5e   : > { %3105 = vmatprep.subr.bf16.mxu1 %v3272_v27 }
  0x60   : > { %3026 = vmatmul.mubr.msk.bf16.gmra.mxu1 %vm791_vm8, %v3925_v4 }
  0x61   : > { %3029 = vmatprep.mubr.msk.bf16.mxu1 %vm791_vm8, %v3935_v45 }
  0x64   : > { %3054 = vmatmul.mubr.msk.bf16.gmra.mxu0 %vm791_vm8, %v3947_v58 }
  0x65   : > { %3089 = vmatprep.mubr.msk.bf16.mxu0 %vm791_vm8, %v3568_v11  ;;  %v3274_v11 = vld [vmem:[%s4417_s3 + $0xb0] sm:$0xff]  }
  0x68   : > { %3030 = vmatmul.mubr.msk.bf16.gmra.mxu1 %vm791_vm8, %v3954_v56 }
  0x69   : > { %3065 = vmatprep.mubr.msk.bf16.mxu1 %vm791_vm8, %v3514_v22  ;;  %v3277_v22 = vld [vmem:[%s4417_s3 + $0xc8] sm:$0xff]  }
  0x6c   : > { %3090 = vmatmul.mubr.msk.bf16.vlgmr.msra.gmra.mxu0 %vm791_vm8, %v3640_v19  ;;  %v3276_v19 = vld [vmem:[%s4417_s3 + $0xa8] sm:$0xff]  }
  0x6d   : > { %3130 = vmatpush3.bf16.msra.mxu0 %v3273_v0  ;;  %3093 = vmatprep.mubr.msk.bf16.mxu0 %vm791_vm8, %v3709_v23  ;;  %v3279_v23 = vld [vmem:[%s4417_s3 + $0xc0] sm:$0xff]  }
  0x6e   : > { %3131 = vmatprep.subr.bf16.mxu0 %v3275_v5 }
  0x70   : > { %3066 = vmatmul.mubr.msk.bf16.vlgmr.msra.gmra.mxu1 %vm791_vm8, %v3593_v36  ;;  %v3278_v36 = vld [vmem:[%s4417_s3 + $0xa0] sm:$0xff]  }
  0x71   : > { %3106 = vmatpush3.bf16.msra.mxu1 %v3272_v27  ;;  %3069 = vmatprep.mubr.msk.bf16.mxu1 %vm791_vm8, %v3665_v30  ;;  %v3281_v30 = vld [vmem:[%s4417_s3 + $0x118] sm:$0xff]  }
  0x72   : > { %3107 = vmatprep.subr.bf16.mxu1 %v3274_v11  ;;  %3132 = vmatpush3.bf16.msra.mxu0 %v3275_v5 }
  0x73   : > { %3133 = vmatprep.subr.bf16.mxu0 %v3277_v22 }
  0x74   : > { %3094 = vmatmul.mubr.msk.bf16.gmra.mxu0 %vm791_vm8, %v3528_v34  ;;  %v3280_v34 = vld [vmem:[%s4417_s3 + $0xf8] sm:$0xff]  }
  0x75   : > { %3108 = vmatpush3.bf16.msra.mxu1 %v3274_v11  ;;  %3097 = vmatprep.mubr.msk.bf16.mxu0 %vm791_vm8, %v3599_v42  ;;  %v3285_v42 = vld [vmem:[%s4417_s3 + $0x108] sm:$0xff]  }
  0x76   : > { %3109 = vmatprep.subr.bf16.mxu1 %v3276_v19  ;;  %3134 = vmatpush3.bf16.msra.mxu0 %v3277_v22 }
  0x77   : > { %3135 = vmatprep.subr.bf16.mxu0 %v3279_v23 }
  0x78   : > { %3070 = vmatmul.mubr.msk.bf16.gmra.mxu1 %vm791_vm8, %v3489_v53  ;;  %v3283_v53 = vld [vmem:[%s4417_s3 + $0x110] sm:$0xff]  }
  0x79   : > { %3073 = vmatprep.mubr.msk.bf16.mxu1 %vm791_vm8, %v3549_v54  ;;  %3110 = vmatpush3.bf16.msra.mxu1 %v3276_v19  ;;  %v3282_v54 = vld [vmem:[%s4417_s3 + $0xf0] sm:$0xff]  }
  0x7a   : > { %3111 = vmatprep.subr.bf16.mxu1 %v3278_v36  ;;  %3136 = vmatpush3.bf16.msra.mxu0 %v3279_v23 }
  0x7b   : > { %3177 = vmatprep.subr.bf16.mxu0 %v3281_v30 }
  0x7c   : > { %3098 = vmatmul.mubr.msk.bf16.gmra.mxu0 %vm791_vm8, %v3669_v44  ;;  %v3287_v44 = vld [vmem:[%s4417_s3 + $0x100] sm:$0xff]  }
  0x7d   : > { %3101 = vmatprep.mubr.msk.bf16.mxu0 %vm791_vm8, %v3728_v41  ;;  %3112 = vmatpush3.bf16.msra.mxu1 %v3278_v36 }
  0x7e   : > { %3153 = vmatprep.subr.bf16.mxu1 %v3280_v34 }
  0x80   : > { %3074 = vmatmul.mubr.msk.bf16.gmra.mxu1 %vm791_vm8, %v3617_v59  ;;  %v3284_v59 = vld [vmem:[%s4417_s3 + $0xe8] sm:$0xff]  }
  0x81   : > { %3077 = vmatprep.mubr.msk.bf16.mxu1 %vm791_vm8, %v3695_v9  ;;  %v3286_v9 = vld [vmem:[%s4417_s3 + $0xe0] sm:$0xff]  }
  0x84   : > { %3102 = vmatmul.mubr.msk.bf16.gmra.mxu0 %vm791_vm8, %v3898_v24 }
  0x85   : > { %3137 = vmatprep.mubr.msk.bf16.mxu0 %vm791_vm8, %v3757_v62 }
  0x88   : > { %3078 = vmatmul.mubr.msk.bf16.gmra.mxu1 %vm791_vm8, %v3834_v6 }
  0x89   : > { %3113 = vmatprep.mubr.msk.bf16.mxu1 %vm791_vm8, %v3722_v33 }
  0x8c   : > { %3138 = vmatmul.mubr.msk.bf16.vlgmr.msra.gmra.mxu0 %vm791_vm8, %v3762_v61 }
  0x8d   : > { %3178 = vmatpush3.bf16.msra.mxu0 %v3281_v30  ;;  %3141 = vmatprep.mubr.msk.bf16.mxu0 %vm791_vm8, %v3778_v63 }
  0x8e   : > { %3179 = vmatprep.subr.bf16.mxu0 %v3283_v53 }
  0x90   : > { %3114 = vmatmul.mubr.msk.bf16.vlgmr.msra.gmra.mxu1 %vm791_vm8, %v3734_v47 }
  0x91   : > { %3154 = vmatpush3.bf16.msra.mxu1 %v3280_v34  ;;  %3117 = vmatprep.mubr.msk.bf16.mxu1 %vm791_vm8, %v3773_v8 }
  0x92   : > { %3155 = vmatprep.subr.bf16.mxu1 %v3282_v54  ;;  %3180 = vmatpush3.bf16.msra.mxu0 %v3283_v53 }
  0x93   : > { %3181 = vmatprep.subr.bf16.mxu0 %v3285_v42 }
  0x94   : > { %3142 = vmatmul.mubr.msk.bf16.gmra.mxu0 %vm791_vm8, %v3925_v4 }
  0x95   : > { %3156 = vmatpush3.bf16.msra.mxu1 %v3282_v54  ;;  %3145 = vmatprep.mubr.msk.bf16.mxu0 %vm791_vm8, %v3935_v45 }
  0x96   : > { %3157 = vmatprep.subr.bf16.mxu1 %v3284_v59  ;;  %3182 = vmatpush3.bf16.msra.mxu0 %v3285_v42 }
  0x97   : > { %3183 = vmatprep.subr.bf16.mxu0 %v3287_v44 }
  0x98   : > { %3118 = vmatmul.mubr.msk.bf16.gmra.mxu1 %vm791_vm8, %v3792_v20 }
  0x99   : > { %3121 = vmatprep.mubr.msk.bf16.mxu1 %vm791_vm8, %v3842_v7  ;;  %3158 = vmatpush3.bf16.msra.mxu1 %v3284_v59 }
  0x9a   : > { %3159 = vmatprep.subr.bf16.mxu1 %v3286_v9  ;;  %3184 = vmatpush3.bf16.msra.mxu0 %v3287_v44 }
  0x9c   : > { %3146 = vmatmul.mubr.msk.bf16.gmra.mxu0 %vm791_vm8, %v3954_v56 }
  0x9d   : > { %3149 = vmatprep.mubr.msk.bf16.mxu0 %vm791_vm8, %v1874_v13  ;;  %3160 = vmatpush3.bf16.msra.mxu1 %v3286_v9 }
  0xa0   : > { %3122 = vmatmul.mubr.msk.bf16.gmra.mxu1 %vm791_vm8, %v3845_v52 }
  0xa1   : > { %3125 = vmatprep.mubr.msk.bf16.mxu1 %vm791_vm8, %v3938_v12 }
  0xa4   : > { %3150 = vmatmul.mubr.msk.bf16.gmra.mxu0 %vm791_vm8, %v1875_v51 }
  0xa5   : > { %3185 = vmatprep.mubr.msk.bf16.mxu0 %vm791_vm8, %v3770_v3 }
  0xa8   : > { %3126 = vmatmul.mubr.msk.bf16.gmra.mxu1 %vm791_vm8, %v3875_v10 }
  0xa9   : > { %3161 = vmatprep.mubr.msk.bf16.mxu1 %vm791_vm8, %v3647_v25 }
  0xac   : > { %3186 = vmatmul.mubr.msk.bf16.vlgmr.msra.gmra.mxu0 %vm791_vm8, %v3814_v31 }
  0xad   : > { %3189 = vmatprep.mubr.msk.bf16.mxu0 %vm791_vm8, %v3824_v1 }
  0xb0   : > { %3162 = vmatmul.mubr.msk.bf16.vlgmr.msra.gmra.mxu1 %vm791_vm8, %v3716_v29 }
  0xb1   : > { %3165 = vmatprep.mubr.msk.bf16.mxu1 %vm791_vm8, %v3537_v37 }
  0xb4   : > { %3190 = vmatmul.mubr.msk.bf16.gmra.mxu0 %vm791_vm8, %v3891_v48 }
  0xb5   : > { %3193 = vmatprep.mubr.msk.bf16.mxu0 %vm791_vm8, %v3906_v15 }
  0xb8   : > { %3166 = vmatmul.mubr.msk.bf16.gmra.mxu1 %vm791_vm8, %v3609_v50 }
  0xb9   : > { %3169 = vmatprep.mubr.msk.bf16.mxu1 %vm791_vm8, %v3681_v55 }
  0xbc   : > { %3194 = vmatmul.mubr.msk.bf16.gmra.mxu0 %vm791_vm8, %v3947_v58 }
  0xbd   : > { %3197 = vmatprep.mubr.msk.bf16.mxu0 %vm791_vm8, %v2251_v60 }
  0xc0   : > { %3170 = vmatmul.mubr.msk.bf16.gmra.mxu1 %vm791_vm8, %v3741_v57 }
  0xc1   : > { %3173 = vmatprep.mubr.msk.bf16.mxu1 %vm791_vm8, %v2066_v14 }
  0xc4   : > { %3198 = vmatmul.mubr.msk.bf16.gmra.mxu0 %vm791_vm8, %v2252_v38 }
  0xc8   : > { %3174 = vmatmul.mubr.msk.bf16.gmra.mxu1 %vm791_vm8, %v2067_v43 }
  0xee   : > { %v2995_v37 = vpop.f32.mrf.mxu0 }
  0xf0   : > { %v850_v25 = vpop.f32.mrf.mxu0 }
  0xf2   : > { %v2996_v55 = vpop.f32.mrf.mxu0 }
  0xf4   : > { %v3003_v50 = vpop.f32.mrf.mxu1  ;;  %v853_v33 = vpop.f32.mrf.mxu0 }
  0xf6   : > { %v882_v46 = vpop.f32.mrf.mxu1 }
  0xf8   : > { %v3004_v29 = vpop.f32.mrf.mxu1 }
  0xfa   : > { %v885_v41 = vpop.f32.mrf.mxu1 }
 0x104   : > { %v2999_v47 = vpop.f32.mrf.mxu0 }
 0x106   : > { %v866_v57 = vpop.f32.mrf.mxu0 }
 0x108   : > { %v3007_v62 = vpop.f32.mrf.mxu1  ;;  %v3000_v61 = vpop.f32.mrf.mxu0 }
 0x10a   : > { %v898_v3 = vpop.f32.mrf.mxu1  ;;  %v869_v8 = vpop.f32.mrf.mxu0 }
 0x10c   : > { %v3008_v63 = vpop.f32.mrf.mxu1  ;;  %v3043_v20 = vpop.f32.mrf.mxu0 }
 0x10e   : > { %v4114_v31 = vpop.f32.mrf.mxu1  ;;  %v1206_v1 = vpop.f32.mrf.mxu0 }
 0x110   : > { %v3019_v6 = vpop.f32.mrf.mxu1  ;;  %v3044_v7 = vpop.f32.mrf.mxu0 }
 0x111   : > { %v1004_v52 = vadd.f32 %v3019_v6, %v2995_v37 }
 0x112   : > { %v995_v35 = vpop.f32.mrf.mxu1  ;;  %v1209_v13 = vpop.f32.mrf.mxu0 }
 0x113   : > { %v4116_v2 = vadd.f32 %v3043_v20, %v1004_v52  ;;  %v996_v51 = vadd.f32 %v995_v35, %v850_v25 }
 0x114   : > { %v3020_v10 = vpop.f32.mrf.mxu1  ;;  %v3047_v0 = vpop.f32.mrf.mxu0 }
 0x115   : > { %v4118_v16 = vadd.f32 %v1206_v1, %v996_v51  ;;  %v1007_v60 = vadd.f32 %v3020_v10, %v2996_v55 }
 0x116   : > { %v998_v17 = vpop.f32.mrf.mxu1  ;;  %v1222_v18 = vpop.f32.mrf.mxu0 }
 0x117   : > { %v4120_v48 = vadd.f32 %v3044_v7, %v1007_v60  ;;  %v999_v49 = vadd.f32 %v998_v17, %v853_v33 }
 0x118   : > { %v3023_v26 = vpop.f32.mrf.mxu1  ;;  %v3048_v28 = vpop.f32.mrf.mxu0 }
 0x119   : > { %v4122_v24 = vadd.f32 %v1209_v13, %v999_v49  ;;  %v1020_v32 = vadd.f32 %v3023_v26, %v2999_v47 }
 0x11a   : > { %v1011_v39 = vpop.f32.mrf.mxu1  ;;  %v1225_v15 = vpop.f32.mrf.mxu0 }
 0x11b   : > { %v4124_v27 = vadd.f32 %v3047_v0, %v1020_v32  ;;  %v1012_v14 = vadd.f32 %v1011_v39, %v866_v57 }
 0x11c   : > { %v3024_v21 = vpop.f32.mrf.mxu1  ;;  %v3051_v38 = vpop.f32.mrf.mxu0 }
 0x11d   : > { %v4126_v40 = vadd.f32 %v1222_v18, %v1012_v14  ;;  %v1023_v4 = vadd.f32 %v3024_v21, %v3000_v61 }
 0x11e   : > { %v1014_v43 = vpop.f32.mrf.mxu1  ;;  %v1238_v45 = vpop.f32.mrf.mxu0 }
 0x11f   : > { %v4128_v12 = vadd.f32 %v3048_v28, %v1023_v4  ;;  %v1015_v58 = vadd.f32 %v1014_v43, %v869_v8 }
 0x120   : > { %v3027_v56 = vpop.f32.mrf.mxu1  ;;  %v3052_v5 = vpop.f32.mrf.mxu0 }
 0x121   : > { %v4130_v11 = vadd.f32 %v1225_v15, %v1015_v58  ;;  %v1036_v22 = vadd.f32 %v3027_v56, %v3003_v50 }
 0x122   : > { %v1027_v19 = vpop.f32.mrf.mxu1  ;;  %v1241_v23 = vpop.f32.mrf.mxu0 }
 0x123   : > { %v4132_v36 = vadd.f32 %v3051_v38, %v1036_v22  ;;  %v1028_v30 = vadd.f32 %v1027_v19, %v882_v46 }
 0x124   : > { %v3028_v34 = vpop.f32.mrf.mxu1  ;;  %v3055_v53 = vpop.f32.mrf.mxu0 }
 0x125   : > { %v4134_v54 = vadd.f32 %v1238_v45, %v1028_v30  ;;  %v1039_v42 = vadd.f32 %v3028_v34, %v3004_v29 }
 0x126   : > { %v1030_v59 = vpop.f32.mrf.mxu1  ;;  %v1254_v44 = vpop.f32.mrf.mxu0 }
 0x127   : > { %v4136_v9 = vadd.f32 %v3052_v5, %v1039_v42  ;;  %v1031_v37 = vadd.f32 %v1030_v59, %v885_v41 }
 0x128   : > { %v3031_v25 = vpop.f32.mrf.mxu1  ;;  %v3056_v55 = vpop.f32.mrf.mxu0 }
 0x129   : > { %v4138_v33 = vadd.f32 %v1241_v23, %v1031_v37  ;;  %v1052_v50 = vadd.f32 %v3031_v25, %v3007_v62 }
 0x12a   : > { %v1043_v47 = vpop.f32.mrf.mxu1  ;;  %v1257_v57 = vpop.f32.mrf.mxu0 }
 0x12b   : > { %v4140_v61 = vadd.f32 %v3055_v53, %v1052_v50  ;;  %v1044_v46 = vadd.f32 %v1043_v47, %v898_v3 }
 0x12c   : > { %v3032_v8 = vpop.f32.mrf.mxu1  ;;  %v4142_v20 = vpop.f32.mrf.mxu0 }
 0x12d   : > { %v4144_v1 = vadd.f32 %v1254_v44, %v1044_v46  ;;  %v1055_v29 = vadd.f32 %v3032_v8, %v3008_v63 }
 0x12e   : > { %v1046_v6 = vpop.f32.mrf.mxu1  ;;  %v4146_v7 = vpop.f32.mrf.mxu0 }
 0x12f   : > { %v4148_v41 = vadd.f32 %v3056_v55, %v1055_v29  ;;  %v1047_v52 = vadd.f32 %v1046_v6, %v4114_v31 }
 0x130   : > { %v3067_v35 = vpop.f32.mrf.mxu1  ;;  %v4151_v62 = vpop.f32.mrf.mxu0 }
 0x131   : > { %v4153_v13 = vadd.f32 %v1257_v57, %v1047_v52 }
 0x132   : > { %v1369_v51 = vpop.f32.mrf.mxu1  ;;  %v4155_v3 = vpop.f32.mrf.mxu0 }
 0x134   : > { %v3068_v10 = vpop.f32.mrf.mxu1  ;;  %v4157_v0 = vpop.f32.mrf.mxu0 }
 0x136   : > { %v1372_v60 = vpop.f32.mrf.mxu1  ;;  %v4159_v63 = vpop.f32.mrf.mxu0 }
 0x138   : > { %v3071_v17 = vpop.f32.mrf.mxu1  ;;  %v4161_v18 = vpop.f32.mrf.mxu0 }
 0x13a   : > { %v1385_v49 = vpop.f32.mrf.mxu1  ;;  %v4163_v26 = vpop.f32.mrf.mxu0 }
 0x13c   : > { %v3072_v31 = vpop.f32.mrf.mxu1  ;;  %v4165_v28 = vpop.f32.mrf.mxu0 }
 0x13e   : > { %v1388_v32 = vpop.f32.mrf.mxu1  ;;  %v4167_v39 = vpop.f32.mrf.mxu0 }
 0x140   : > { %v4169_v15 = vpop.f32.mrf.mxu1  ;;  %v4171_v14 = vpop.f32.mrf.mxu0 }
 0x142   : > { %v1401_v21 = vpop.f32.mrf.mxu1  ;;  %v4173_v38 = vpop.f32.mrf.mxu0 }
 0x144   : > { %v4175_v4 = vpop.f32.mrf.mxu1  ;;  %v4177_v43 = vpop.f32.mrf.mxu0 }
 0x145   : > { %4426 = vst [vmem:[#allocation2_spill] sm:$0xff] %v4177_v43 }
 0x146   : > { %v4179_v45 = vpop.f32.mrf.mxu1  ;;  %v4181_v58 = vpop.f32.mrf.mxu0 }
 0x147   : > { %4427 = vst [vmem:[#allocation3_spill] sm:$0xff] %v4181_v58 }
 0x148   : > { %v4183_v56 = vpop.f32.mrf.mxu1  ;;  %v4185_v5 = vpop.f32.mrf.mxu0 }
 0x149   : > { %4428 = vst [vmem:[#allocation4_spill] sm:$0xff] %v4185_v5 }
 0x14a   : > { %v4187_v22 = vpop.f32.mrf.mxu1  ;;  %v4189_v19 = vpop.f32.mrf.mxu0 }
 0x14b   : > { %4429 = vst [vmem:[#allocation5_spill] sm:$0xff] %v4189_v19 }
 0x14c   : > { %v4191_v23 = vpop.f32.mrf.mxu1  ;;  %v3139_v30 = vpop.f32.mrf.mxu0 }
 0x14e   : > { %v4193_v34 = vpop.f32.mrf.mxu1  ;;  %v4195_v53 = vpop.f32.mrf.mxu0 }
 0x150   : > { %v3115_v42 = vpop.f32.mrf.mxu1  ;;  %v4197_v59 = vpop.f32.mrf.mxu0 }
 0x152   : > { %v1725_v44 = vpop.f32.mrf.mxu1  ;;  %v4199_v37 = vpop.f32.mrf.mxu0 }
 0x153   : > { %4430 = vst [vmem:[#allocation6_spill] sm:$0xff] %v4199_v37 }
 0x154   : > { %v3116_v25 = vpop.f32.mrf.mxu1  ;;  %v4201_v55 = vpop.f32.mrf.mxu0 }
 0x155   : > { %4431 = vst [vmem:[#allocation7_spill] sm:$0xff] %v4201_v55 }
 0x156   : > { %v4203_v50 = vpop.f32.mrf.mxu1  ;;  %v4205_v47 = vpop.f32.mrf.mxu0 }
 0x157   : > { %4432 = vst [vmem:[#allocation8_spill] sm:$0xff] %v4205_v47 }
 0x158   : > { %v4207_v57 = vpop.f32.mrf.mxu1  ;;  %v4209_v46 = vpop.f32.mrf.mxu0 }
 0x159   : > { %4433 = vst [vmem:[#allocation9_spill] sm:$0xff] %v4209_v46 }
 0x15a   : > { %v4211_v8 = vpop.f32.mrf.mxu1  ;;  %v4213_v29 = vpop.f32.mrf.mxu0 }
 0x15b   : > { %4434 = vst [vmem:[#allocation10_spill] sm:$0xff] %v4213_v29 }
 0x15c   : > { %v4215_v6 = vpop.f32.mrf.mxu1  ;;  %v4217_v52 = vpop.f32.mrf.mxu0 }
 0x15d   : > { %4435 = vst [vmem:[#allocation11_spill] sm:$0xff] %v4217_v52  ;;  %v1434_v52 = vadd.f32 %v3067_v35, %v4116_v2 }
 0x15e   : > { %v4219_v19 = vpop.f32.mrf.mxu1  ;;  %v4221_v55 = vpop.f32.mrf.mxu0 }
 0x15f   : > { %4436 = vst [vmem:[#allocation12_spill] sm:$0xff] %v4219_v19  ;;  %4437 = vst [vmem:[#allocation13_spill] sm:$0xff] %v4221_v55 }
 0x160   : > { %v4223_v5 = vpop.f32.mrf.mxu1  ;;  %v4225_v47 = vpop.f32.mrf.mxu0 }
 0x161   : > { %4438 = vst [vmem:[#allocation14_spill] sm:$0xff] %v4223_v5  ;;  %4439 = vst [vmem:[#allocation15_spill] sm:$0xff] %v4225_v47  ;;  %v1432_v5 = vadd.f32 %v1369_v51, %v4118_v16  ;;  %v1438_v16 = vadd.f32 %v3071_v17, %v4124_v27  ;;  %v1436_v51 = vadd.f32 %v1385_v49, %v4126_v40 }
 0x162   : > { %v4228_v58 = vpop.f32.mrf.mxu1  ;;  %v4230_v46 = vpop.f32.mrf.mxu0 }
 0x163   : > { %4440 = vst [vmem:[#allocation16_spill] sm:$0xff] %v4228_v58  ;;  %4441 = vst [vmem:[#allocation17_spill] sm:$0xff] %v4230_v46  ;;  %v1615_v46 = vadd.f32 %v4142_v20, %v1434_v52  ;;  %v1613_v35 = vadd.f32 %v4146_v7, %v1432_v5  ;;  %v1437_v20 = vadd.f32 %v1388_v32, %v4130_v11 }
 0x164   : > { %v4232_v37 = vpop.f32.mrf.mxu1  ;;  %v4234_v29 = vpop.f32.mrf.mxu0  ;;  %v1440_v7 = vadd.f32 %v1401_v21, %v4134_v54  ;;  %v1617_v11 = vadd.f32 %v4159_v63, %v1436_v51  ;;  %v1441_v54 = vadd.f32 %v4179_v45, %v4138_v33  ;;  %v1444_v33 = vadd.f32 %v4187_v22, %v4144_v1  ;;  %v4453_v51 = vld [vmem:[#allocation7_spill] sm:$0xff] }
 0x165   : > { %4442 = vst [vmem:[#allocation18_spill] sm:$0xff] %v4232_v37  ;;  %4443 = vst [vmem:[#allocation19_spill] sm:$0xff] %v4234_v29  ;;  %v1435_v37 = vadd.f32 %v3068_v10, %v4120_v48  ;;  %v1433_v29 = vadd.f32 %v1372_v60, %v4122_v24  ;;  %v1442_v10 = vadd.f32 %v4169_v15, %v4132_v36 }
 0x166   : > { %v4238_v43 = vpop.f32.mrf.mxu1  ;;  %v4240_v55 = vpop.f32.mrf.mxu0  ;;  %v1788_v60 = vadd.f32 %v1725_v44, %v1613_v35  ;;  %v1618_v32 = vadd.f32 %v4163_v26, %v1437_v20  ;;  %v1443_v36 = vadd.f32 %v4175_v4, %v4136_v9  ;;  %v1446_v9 = vadd.f32 %v4183_v56, %v4140_v61  ;;  %v4446_v44 = vld [vmem:[#allocation12_spill] sm:$0xff] }
 0x167   : > { %4444 = vst [vmem:[#allocation20_spill] sm:$0xff] %v4240_v55  ;;  %v1790_v55 = vadd.f32 %v3115_v42, %v1615_v46  ;;  %v1616_v24 = vadd.f32 %v4151_v62, %v1435_v37  ;;  %v1614_v27 = vadd.f32 %v4155_v3, %v1433_v29  ;;  %v1623_v21 = vadd.f32 %v4165_v28, %v1442_v10  ;;  %v4451_v29 = vld [vmem:[#allocation3_spill] sm:$0xff] }
 0x168   : > { %v4243_v19 = vpop.f32.mrf.mxu1  ;;  %v4245_v47 = vpop.f32.mrf.mxu0  ;;  %v2030_v63 = vadd.f32 %v4195_v53, %v1788_v60  ;;  %v1624_v42 = vadd.f32 %v4171_v14, %v1443_v36  ;;  %v1622_v61 = vadd.f32 %v4173_v38, %v1441_v54  ;;  %v1445_v1 = vadd.f32 %v4193_v34, %v4153_v13 }
 0x169   : > { %4445 = vst [vmem:[#allocation21_spill] sm:$0xff] %v4245_v47  ;;  %v1439_v47 = vadd.f32 %v3072_v31, %v4128_v12  ;;  %v1619_v12 = vadd.f32 %v4157_v0, %v1438_v16  ;;  %v2032_v49 = vadd.f32 %v3139_v30, %v1790_v55  ;;  %v1791_v31 = vadd.f32 %v3116_v25, %v1616_v24  ;;  %v4447_v55 = vld [vmem:[#allocation2_spill] sm:$0xff]  ;;  %v4454_v24 = vld [vmem:[#allocation5_spill] sm:$0xff] }
 0x16a   : > { %v4251_v58 = vpop.f32.mrf.mxu1  ;;  %v4253_v2 = vpop.f32.mrf.mxu0  ;;  %v1621_v0 = vadd.f32 %v4167_v39, %v1440_v7  ;;  %v1789_v26 = vadd.f32 %v4203_v50, %v1614_v27  ;;  %v1627_v14 = vadd.f32 %v4447_v55, %v1446_v9  ;;  %v4448_v50 = vld [vmem:[#allocation6_spill] sm:$0xff]  ;;  %v4450_v13 = vld [vmem:[#allocation16_spill] sm:$0xff]  ;;  %v1625_v35 = vadd.f32 %v4451_v29, %v1444_v33 }
 0x16b   : > { %v1620_v62 = vadd.f32 %v4161_v18, %v1439_v47  ;;  %v1447_v18 = vadd.f32 %v4191_v23, %v4148_v41  ;;  %v2033_v4 = vadd.f32 %v4197_v59, %v1791_v31  ;;  %v1794_v45 = vadd.f32 %v4207_v57, %v1619_v12  ;;  %v4449_v47 = vld [vmem:[#allocation14_spill] sm:$0xff]  ;;  %v4455_v7 = vld [vmem:[#allocation8_spill] sm:$0xff]  ;;  %v4457_v31 = vld [vmem:[#allocation9_spill] sm:$0xff] }
 0x16c   : > { %v4260_v52 = vpop.f32.mrf.mxu1  ;;  %v3187_v48 = vpop.f32.mrf.mxu0  ;;  %v1792_v41 = vadd.f32 %v4211_v8, %v1617_v11  ;;  %v1793_v59 = vadd.f32 %v4446_v44, %v1618_v32  ;;  %v2031_v38 = vadd.f32 %v4448_v50, %v1789_v26  ;;  %v1798_v57 = vadd.f32 %v4449_v47, %v1623_v21  ;;  %v4456_v27 = vld [vmem:[#allocation18_spill] sm:$0xff] }
 0x16d   : > { %v1795_v23 = vadd.f32 %v4215_v6, %v1620_v62  ;;  %v1796_v34 = vadd.f32 %v4450_v13, %v1621_v0  ;;  %v4452_v6 = vld [vmem:[#allocation4_spill] sm:$0xff]  ;;  %v2036_v20 = vadd.f32 %v4453_v51, %v1794_v45  ;;  %v4313_v10 = vadd.f32 %v4454_v24, %v1445_v1  ;;  %v4458_v32 = vld [vmem:[#allocation10_spill] sm:$0xff]  ;;  %v4460_v0 = vld [vmem:[#allocation13_spill] sm:$0xff] }
 0x16e   : > { %v4267_v40 = vpop.f32.mrf.mxu1  ;;  %v2344_v17 = vpop.f32.mrf.mxu0  ;;  %v1628_v16 = vadd.f32 %v4452_v6, %v1447_v18  ;;  %v2034_v60 = vadd.f32 %v4455_v7, %v1792_v41  ;;  %v2035_v36 = vadd.f32 %v4458_v32, %v1793_v59  ;;  %v1797_v54 = vadd.f32 %v4238_v43, %v1622_v61 }
 0x16f   : > { %v2037_v62 = vadd.f32 %v4457_v31, %v1795_v23  ;;  %v1802_v26 = vadd.f32 %v4243_v19, %v1627_v14 }
 0x170   : > { %v3163_v3 = vpop.f32.mrf.mxu1  ;;  %v3188_v15 = vpop.f32.mrf.mxu0 }
 0x171   : > { %v2224_v5 = vadd.f32 %v3163_v3, %v2032_v49 }
 0x172   : > { %v2159_v28 = vpop.f32.mrf.mxu1  ;;  %v2347_v39 = vpop.f32.mrf.mxu0 }
 0x173   : > { %v2409_v30 = vadd.f32 %v3187_v48, %v2224_v5  ;;  %v2222_v53 = vadd.f32 %v2159_v28, %v2030_v63  ;;  %v2038_v63 = vadd.f32 %v4460_v0, %v1796_v34 }
 0x174   : > { %v3164_v56 = vpop.f32.mrf.mxu1  ;;  %v3191_v22 = vpop.f32.mrf.mxu0 }
 0x175   : > { %2425 = vst.msk [vmem:[%s4283_s30 + $0x10] sm:$0xff] %vm791_vm8, %v2409_v30  ;;  %v2407_v37 = vadd.f32 %v2344_v17, %v2222_v53  ;;  %v2225_v25 = vadd.f32 %v3164_v56, %v2033_v4  ;;  %v1799_v17 = vadd.f32 %v4456_v27, %v1624_v42  ;;  %v2480_v28 = vmul.f32 %v2409_v30, %v2409_v30  ;;  %v4461_v53 = vld [vmem:[#allocation15_spill] sm:$0xff] }
 0x176   : > { %v2162_v46 = vpop.f32.mrf.mxu1  ;;  %v2360_v8 = vpop.f32.mrf.mxu0  ;;  %v2442_v44 = vsel %vm791_vm8, %v2409_v30, 0.0  ;;  %v1803_v27 = vadd.f32 %v4260_v52, %v1628_v16 }
 0x177   : > { %2423 = vst.msk [vmem:[%s4283_s30] sm:$0xff] %vm791_vm8, %v2407_v37  ;;  %v2410_v48 = vadd.f32 %v3188_v15, %v2225_v25  ;;  %v2223_v12 = vadd.f32 %v2162_v46, %v2031_v38  ;;  %v4459_v15 = vld [vmem:[#allocation11_spill] sm:$0xff]  ;;  %v2478_v5 = vmul.f32 %v2407_v37, %v2407_v37  ;;  %v2041_v42 = vadd.f32 %v4461_v53, %v1799_v17 }
 0x178   : > { %v3167_v11 = vpop.f32.mrf.mxu1  ;;  %v3192_v49 = vpop.f32.mrf.mxu0  ;;  %v2040_v21 = vadd.f32 %v4459_v15, %v1798_v57  ;;  %v2439_v43 = vsel %vm791_vm8, %v2407_v37, 0.0  ;;  %v4463_v38 = vld [vmem:[#allocation19_spill] sm:$0xff]  ;;  %v2497_v57 = vsel %vm791_vm8, %v2480_v28, 0.0  ;;  %v4464_v28 = vld [vmem:[#allocation20_spill] sm:$0xff] }
 0x179   : > { %2426 = vst.msk [vmem:[%s4283_s30 + $0x18] sm:$0xff] %vm791_vm8, %v2410_v48  ;;  %v2228_v3 = vadd.f32 %v3167_v11, %v2036_v20  ;;  %v2408_v9 = vadd.f32 %v2347_v39, %v2223_v12  ;;  %v4462_v39 = vld [vmem:[#allocation17_spill] sm:$0xff]  ;;  %v2494_v59 = vsel %vm791_vm8, %v2478_v5, 0.0  ;;  %v2481_v25 = vmul.f32 %v2410_v48, %v2410_v48 }
 0x17a   : > { %v2175_v33 = vpop.f32.mrf.mxu1  ;;  %v2363_v18 = vpop.f32.mrf.mxu0  ;;  %v2039_v23 = vadd.f32 %v4462_v39, %v1797_v54  ;;  %v2044_v47 = vadd.f32 %v4463_v38, %v1802_v26  ;;  %v2444_v30 = vsel %vm791_vm8, %v2410_v48, 0.0  ;;  %v1800_v20 = vadd.f32 %v4251_v58, %v1625_v35 }
 0x17b   : > { %v2413_v4 = vadd.f32 %v3191_v22, %v2228_v3  ;;  %v2226_v45 = vadd.f32 %v2175_v33, %v2034_v60  ;;  %2424 = vst.msk [vmem:[%s4283_s30 + $0x8] sm:$0xff] %vm791_vm8, %v2408_v9  ;;  %v2440_v61 = vsel %vm791_vm8, %v2408_v9, 0.0  ;;  %v2479_v1 = vmul.f32 %v2408_v9, %v2408_v9 }
 0x17c   : > { %v3168_v41 = vpop.f32.mrf.mxu1  ;;  %v3195_v56 = vpop.f32.mrf.mxu0  ;;  %v2441_v19 = vadd.f32 %v2440_v61, %v2439_v43  ;;  %v2499_v17 = vsel %vm791_vm8, %v2481_v25, 0.0  ;;  %v1801_v3 = vadd.f32 %v4267_v40, %v4313_v10 }
 0x17d   : > { %2429 = vst.msk [vmem:[%s4283_s30 + $0x30] sm:$0xff] %vm791_vm8, %v2413_v4  ;;  %v2411_v22 = vadd.f32 %v2360_v8, %v2226_v45  ;;  %v2495_v37 = vsel %vm791_vm8, %v2479_v1, 0.0  ;;  %v2229_v55 = vadd.f32 %v3168_v41, %v2037_v62  ;;  %v2484_v35 = vmul.f32 %v2413_v4, %v2413_v4 }
 0x17e   : > { %v2178_v14 = vpop.f32.mrf.mxu1  ;;  %v2376_v50 = vpop.f32.mrf.mxu0  ;;  %v2443_v13 = vadd.f32 %v2442_v44, %v2441_v19  ;;  %v2496_v34 = vadd.f32 %v2495_v37, %v2494_v59  ;;  %v2450_v15 = vsel %vm791_vm8, %v2413_v4, 0.0  ;;  %v2042_v45 = vadd.f32 %v4464_v28, %v1800_v20 }
 0x17f   : > { %2427 = vst.msk [vmem:[%s4283_s30 + $0x20] sm:$0xff] %vm791_vm8, %v2411_v22  ;;  %v2482_v46 = vmul.f32 %v2411_v22, %v2411_v22  ;;  %v2414_v8 = vadd.f32 %v3192_v49, %v2229_v55  ;;  %v2227_v29 = vadd.f32 %v2178_v14, %v2035_v36  ;;  %v2446_v12 = vsel %vm791_vm8, %v2411_v22, 0.0  ;;  %v4465_v22 = vld [vmem:[#allocation21_spill] sm:$0xff] }
 0x180   : > { %v3171_v6 = vpop.f32.mrf.mxu1  ;;  %v3196_v51 = vpop.f32.mrf.mxu0  ;;  %v2498_v24 = vadd.f32 %v2497_v57, %v2496_v34  ;;  %v2445_v7 = vadd.f32 %v2444_v30, %v2443_v13  ;;  %v2505_v40 = vsel %vm791_vm8, %v2484_v35, 0.0  ;;  %v2045_v59 = vadd.f32 %v4465_v22, %v1803_v27 }
 0x181   : > { %v2232_v60 = vadd.f32 %v3171_v6, %v2040_v21  ;;  %2430 = vst.msk [vmem:[%s4283_s30 + $0x38] sm:$0xff] %vm791_vm8, %v2414_v8  ;;  %v2412_v48 = vadd.f32 %v2363_v18, %v2227_v29  ;;  %v2501_v36 = vsel %vm791_vm8, %v2482_v46, 0.0  ;;  %v2485_v5 = vmul.f32 %v2414_v8, %v2414_v8 }
 0x182   : > { %v2191_v11 = vpop.f32.mrf.mxu1  ;;  %v2379_v49 = vpop.f32.mrf.mxu0  ;;  %v2447_v31 = vadd.f32 %v2446_v12, %v2445_v7  ;;  %v2500_v62 = vadd.f32 %v2499_v17, %v2498_v24  ;;  %v2452_v10 = vsel %vm791_vm8, %v2414_v8, 0.0 }
 0x183   : > { %v2417_v32 = vadd.f32 %v3195_v56, %v2232_v60  ;;  %v2230_v58 = vadd.f32 %v2191_v11, %v2038_v63  ;;  %2428 = vst.msk [vmem:[%s4283_s30 + $0x28] sm:$0xff] %vm791_vm8, %v2412_v48  ;;  %v2448_v52 = vsel %vm791_vm8, %v2412_v48, 0.0  ;;  %v2483_v16 = vmul.f32 %v2412_v48, %v2412_v48 }
 0x184   : > { %v3172_v54 = vpop.f32.mrf.mxu1  ;;  %v2502_v21 = vadd.f32 %v2501_v36, %v2500_v62  ;;  %v2449_v0 = vadd.f32 %v2448_v52, %v2447_v31  ;;  %v3199_v63 = vpop.f32.mrf.mxu0  ;;  %v2507_v25 = vsel %vm791_vm8, %v2485_v5, 0.0 }
 0x185   : > { %2433 = vst.msk [vmem:[%s4283_s30 + $0x50] sm:$0xff] %vm791_vm8, %v2417_v32  ;;  %v2503_v9 = vsel %vm791_vm8, %v2483_v16, 0.0  ;;  %v2415_v33 = vadd.f32 %v2376_v50, %v2230_v58  ;;  %v2233_v18 = vadd.f32 %v3172_v54, %v2041_v42  ;;  %v2488_v57 = vmul.f32 %v2417_v32, %v2417_v32 }
 0x186   : > { %v2194_v26 = vpop.f32.mrf.mxu1  ;;  %v2451_v53 = vadd.f32 %v2450_v15, %v2449_v0  ;;  %v2504_v43 = vadd.f32 %v2503_v9, %v2502_v21  ;;  %v2392_v19 = vpop.f32.mrf.mxu0  ;;  %v2458_v20 = vsel %vm791_vm8, %v2417_v32, 0.0 }
 0x187   : > { %v2231_v61 = vadd.f32 %v2194_v26, %v2039_v23  ;;  %2431 = vst.msk [vmem:[%s4283_s30 + $0x40] sm:$0xff] %vm791_vm8, %v2415_v33  ;;  %v2486_v4 = vmul.f32 %v2415_v33, %v2415_v33  ;;  %v2418_v1 = vadd.f32 %v3196_v51, %v2233_v18  ;;  %v2043_v23 = vadd.f32 %v4253_v2, %v1801_v3 }
 0x188   : > { %v3175_v41 = vpop.f32.mrf.mxu1  ;;  %v2506_v56 = vadd.f32 %v2505_v40, %v2504_v43  ;;  %v2453_v39 = vadd.f32 %v2452_v10, %v2451_v53  ;;  %v2454_v37 = vsel %vm791_vm8, %v2415_v33, 0.0  ;;  %v3200_v51 = vpop.f32.mrf.mxu0  ;;  %v2513_v11 = vsel %vm791_vm8, %v2488_v57, 0.0 }
 0x189   : > { %v2416_v42 = vadd.f32 %v2379_v49, %v2231_v61  ;;  %v2236_v44 = vadd.f32 %v3175_v41, %v2044_v47  ;;  %2434 = vst.msk [vmem:[%s4283_s30 + $0x58] sm:$0xff] %vm791_vm8, %v2418_v1  ;;  %v2509_v13 = vsel %vm791_vm8, %v2486_v4, 0.0  ;;  %v2489_v24 = vmul.f32 %v2418_v1, %v2418_v1 }
 0x18a   : > { %v2207_v55 = vpop.f32.mrf.mxu1  ;;  %v2455_v14 = vadd.f32 %v2454_v37, %v2453_v39  ;;  %v2508_v50 = vadd.f32 %v2507_v25, %v2506_v56  ;;  %v2460_v49 = vsel %vm791_vm8, %v2418_v1, 0.0  ;;  %v2395_v32 = vpop.f32.mrf.mxu0 }
 0x18b   : > { %2432 = vst.msk [vmem:[%s4283_s30 + $0x48] sm:$0xff] %vm791_vm8, %v2416_v42  ;;  %v2456_v38 = vsel %vm791_vm8, %v2416_v42, 0.0  ;;  %v2487_v47 = vmul.f32 %v2416_v42, %v2416_v42  ;;  %v2421_v34 = vadd.f32 %v3199_v63, %v2236_v44  ;;  %v2234_v2 = vadd.f32 %v2207_v55, %v2042_v45 }
 0x18c   : > { %v3176_v30 = vpop.f32.mrf.mxu1  ;;  %v2510_v46 = vadd.f32 %v2509_v13, %v2508_v50  ;;  %v2457_v8 = vadd.f32 %v2456_v38, %v2455_v14  ;;  %v2515_v35 = vsel %vm791_vm8, %v2489_v24, 0.0 }
 0x18d   : > { %v2511_v29 = vsel %vm791_vm8, %v2487_v47, 0.0  ;;  %v2237_v6 = vadd.f32 %v3176_v30, %v2045_v59  ;;  %2437 = vst.msk [vmem:[%s4283_s30 + $0x70] sm:$0xff] %vm791_vm8, %v2421_v34  ;;  %v2419_v7 = vadd.f32 %v2392_v19, %v2234_v2  ;;  %v2492_v3 = vmul.f32 %v2421_v34, %v2421_v34 }
 0x18e   : > { %v2210_v60 = vpop.f32.mrf.mxu1  ;;  %v2459_v27 = vadd.f32 %v2458_v20, %v2457_v8  ;;  %v2512_v17 = vadd.f32 %v2511_v29, %v2510_v46  ;;  %v2466_v9 = vsel %vm791_vm8, %v2421_v34, 0.0 }
 0x18f   : > { %v2422_v12 = vadd.f32 %v3200_v51, %v2237_v6  ;;  %v2235_v48 = vadd.f32 %v2210_v60, %v2043_v23  ;;  %2435 = vst.msk [vmem:[%s4283_s30 + $0x60] sm:$0xff] %vm791_vm8, %v2419_v7  ;;  %v2490_v31 = vmul.f32 %v2419_v7, %v2419_v7  ;;  %v2462_v36 = vsel %vm791_vm8, %v2419_v7, 0.0 }
 0x190   : > { %v2514_v62 = vadd.f32 %v2513_v11, %v2512_v17  ;;  %v2461_v58 = vadd.f32 %v2460_v49, %v2459_v27  ;;  %v2521_v45 = vsel %vm791_vm8, %v2492_v3, 0.0 }
 0x191   : > { %2438 = vst.msk [vmem:[%s4283_s30 + $0x78] sm:$0xff] %vm791_vm8, %v2422_v12  ;;  %v2420_v52 = vadd.f32 %v2395_v32, %v2235_v48  ;;  %v2517_v15 = vsel %vm791_vm8, %v2490_v31, 0.0  ;;  %v2493_v33 = vmul.f32 %v2422_v12, %v2422_v12  ;;  %v2468_v53 = vsel %vm791_vm8, %v2422_v12, 0.0 }
 0x192   : > { %v2463_v16 = vadd.f32 %v2462_v36, %v2461_v58  ;;  %v2516_v54 = vadd.f32 %v2515_v35, %v2514_v62 }
 0x193   : > { %2436 = vst.msk [vmem:[%s4283_s30 + $0x68] sm:$0xff] %vm791_vm8, %v2420_v52  ;;  %v2464_v21 = vsel %vm791_vm8, %v2420_v52, 0.0  ;;  %v2491_v0 = vmul.f32 %v2420_v52, %v2420_v52  ;;  %v2523_v40 = vsel %vm791_vm8, %v2493_v33, 0.0 }
 0x194   : > { %v2518_v63 = vadd.f32 %v2517_v15, %v2516_v54  ;;  %v2465_v5 = vadd.f32 %v2464_v21, %v2463_v16 }
 0x195   : > { %v2519_v18 = vsel %vm791_vm8, %v2491_v0, 0.0 }
 0x196   : > { %v2467_v26 = vadd.f32 %v2466_v9, %v2465_v5  ;;  %v2520_v28 = vadd.f32 %v2519_v18, %v2518_v63 }
 0x198   : > { %v2469_v43 = vadd.f32 %v2468_v53, %v2467_v26  ;;  %v2522_v61 = vadd.f32 %v2521_v45, %v2520_v28 }
 0x19a   : > { %v2470_v10 = vrot.slane %v2469_v43, 4  ;;  %v2524_v4 = vadd.f32 %v2523_v40, %v2522_v61 }
 0x19c   : > { %v2471_v1 = vadd.f32 %v2470_v10, %v2469_v43  ;;  %v2525_v41 = vrot.slane %v2524_v4, 4 }
 0x19e   : > { %v2472_v56 = vrot.slane %v2471_v1, 2  ;;  %v2526_v39 = vadd.f32 %v2525_v41, %v2524_v4 }
 0x1a0   : > { %v2473_v42 = vadd.f32 %v2472_v56, %v2471_v1  ;;  %v2527_v44 = vrot.slane %v2526_v39, 2 }
 0x1a2   : > { %v2474_v19 = vrot.slane %v2473_v42, 1  ;;  %v2528_v22 = vadd.f32 %v2527_v44, %v2526_v39 }
 0x1a4   : > { %v2475_v59 = vadd.f32 %v2474_v19, %v2473_v42  ;;  %v2529_v23 = vrot.slane %v2528_v22, 1 }
 0x1a6   : > { %2477 = vst.msk [vmem:[%s270_s11] sm:$0x1] %vm2476_vm14, %v2475_v59  ;;  %v2530_v25 = vadd.f32 %v2529_v23, %v2528_v22 }
 0x1a8   : > { %2531 = vst.msk [vmem:[%s270_s11 + $0x1] sm:$0x1] %vm2476_vm14, %v2530_v25 }
 0x1a9 PF: > { %s16_s22 = sadd.s32 1, %s3326_s22   ;;  %s4466_s18 = smov %s3318_s20 }
 0x1aa   : > { %p13_p10 = scmp.ge.s32.totalorder %s16_s22, 6   ;;  %s4467_s19 = smov %s3322_s21 }
 0x1ab   : > { %s4468_s20 = smov %s4471_s23  ;;  %s4469_s21 = smov %s4475_s24 }
 0x1ac   :  { %15 = sbr.rel (!%p13_p10) target bundleno = 3 (0x3), region = 87 }

</bundles_post_ra>
